<compile_context>
chip_gen: v5e
topology: v5e:2x2
jax: 0.10.0
libtpu: 0.0.40
codegen_flags: <defaults>
</compile_context>

<pallas_src>
import functools

import jax
import jax.numpy as jnp
from jax import lax
from jax.experimental import pallas as pl
from jax.experimental.pallas import tpu as pltpu


def _encoder_gru_kernel(tok_ref, emb_ref, wih_ref, whh_ref, bih_ref, bhhn_ref,
                        out_ref, hid_ref, *, S, B, H):
    """Fused embedding gather + GRU recurrence (single invocation, no grid).

    tok_ref  : SMEM (B, S)   int32 token ids
    emb_ref  : VMEM (V, E)   f32 embedding table
    wih_ref  : VMEM (E, 3H)  f32  == W_ih^T
    whh_ref  : VMEM (H, 3H)  f32  == W_hh^T
    bih_ref  : VMEM (1, 3H)  f32  == b_ih + [b_hh_r, b_hh_z, 0]
    bhhn_ref : VMEM (1, H)   f32  == b_hh_n
    out_ref  : VMEM (B, S*H) f32  batch-first, lane-dense
    hid_ref  : VMEM (B, H)   f32  final hidden state
    """
    # --- Embedding gather, time-major rows (row t*B + b). Dropout(p=0.5) is eval identity. ---
    rows = []
    for t in range(S):
        for b in range(B):
            tok = tok_ref[b, t]                        # scalar read from SMEM
            rows.append(emb_ref[pl.ds(tok, 1), :])     # (1, E) dynamic-row load
    x = jnp.concatenate(rows, axis=0)                  # (S*B, E) f32, stays in vregs

    # --- Batched input projection for ALL timesteps: one MXU matmul, hoisted off the chain. ---
    gi_all = jnp.dot(x, wih_ref[...], preferred_element_type=jnp.float32) + bih_ref[...]

    whh = whh_ref[...]       # (H, 3H), loaded once
    bhh_n = bhhn_ref[...]    # (1, H),  loaded once

    # --- Serial recurrence (unrolled; S small & static). PyTorch gate order [r, z, n]. ---
    h = jnp.zeros((B, H), jnp.float32)
    for t in range(S):
        gi = gi_all[t * B:(t + 1) * B, :]              # static slice of a value (h-independent)
        gh = jnp.dot(h, whh, preferred_element_type=jnp.float32)
        # r gates n -> it is on the serial chain: one EUP push via tanh form of sigmoid.
        r = 0.5 * (jnp.tanh(0.5 * (gi[:, 0 * H:1 * H] + gh[:, 0 * H:1 * H])) + 1.0)
        z = jax.nn.sigmoid(gi[:, 1 * H:2 * H] + gh[:, 1 * H:2 * H])
        n = jnp.tanh(gi[:, 2 * H:3 * H] + r * (gh[:, 2 * H:3 * H] + bhh_n))
        h = (1.0 - z) * n + z * h
        out_ref[:, t * H:(t + 1) * H] = h              # static lane-slice store (batch-first)
    hid_ref[...] = h                                   # single final store


def init_encoder_params(emb_table, w_ih, w_hh, b_ih, b_hh):
    """One-time preprocessing (torch layout -> kernel layout): transpose weights, fold biases."""
    H = w_hh.shape[1]
    bias_fused = b_ih.astype(jnp.float32).at[:2 * H].add(b_hh[:2 * H].astype(jnp.float32))
    return {
        "emb":   emb_table.astype(jnp.float32),                     # (V, E)
        "wih_t": w_ih.T.astype(jnp.float32),                        # (E, 3H)
        "whh_t": w_hh.T.astype(jnp.float32),                        # (H, 3H)
        "bias":  bias_fused.reshape(1, 3 * H),                      # (1, 3H) = b_ih + [b_hh_r, b_hh_z, 0]
        "bhh_n": b_hh[2 * H:].reshape(1, H).astype(jnp.float32),    # (1, H)
    }


@jax.jit
def encoder_rnn_forward(tokens, params):
    """tokens: (B, S) int32. Mirrors EncoderRNN.forward in eval mode (batch_first=True)."""
    B, S = tokens.shape
    H = params["whh_t"].shape[0]
    # TODO(synk): torch Dropout(p=0.5) in training mode is stochastic; eval-mode identity used.
    # TODO(synk): `.squeeze()` in the torch module only changes semantics for B == 1; B, S > 1 assumed.
    out2d, hidden = pl.pallas_call(
        functools.partial(_encoder_gru_kernel, S=S, B=B, H=H),
        out_shape=(jax.ShapeDtypeStruct((B, S * H), jnp.float32),
                   jax.ShapeDtypeStruct((B, H), jnp.float32)),
        in_specs=[
            pl.BlockSpec(memory_space=pltpu.MemorySpace.SMEM),   # tokens (scalar reads)
            pl.BlockSpec(memory_space=pltpu.MemorySpace.VMEM),   # embedding table
            pl.BlockSpec(memory_space=pltpu.MemorySpace.VMEM),   # W_ih^T
            pl.BlockSpec(memory_space=pltpu.MemorySpace.VMEM),   # W_hh^T
            pl.BlockSpec(memory_space=pltpu.MemorySpace.VMEM),   # fused bias
            pl.BlockSpec(memory_space=pltpu.MemorySpace.VMEM),   # b_hh_n
        ],
        out_specs=(pl.BlockSpec(memory_space=pltpu.MemorySpace.VMEM),
                   pl.BlockSpec(memory_space=pltpu.MemorySpace.VMEM)),
    )(tokens, params["emb"], params["wih_t"], params["whh_t"], params["bias"], params["bhh_n"])
    output = out2d.reshape(B, S, H)     # free: already batch-first & lane-dense
    hidden = hidden.reshape(1, B, H)    # (num_layers=1, B, H)
    return output, hidden


def encoder_rnn_reference(tokens, emb_table, w_ih, w_hh, b_ih, b_hh):
    """Pure-JAX f32 reference (lax.scan) replicating torch.nn.GRU semantics."""
    B, S = tokens.shape
    H = w_hh.shape[1]
    x = jnp.take(emb_table, tokens, axis=0)                  # (B, S, E)
    x_tm = jnp.transpose(x, (1, 0, 2))                       # (S, B, E)

    def step(h, x_t):
        gi = x_t @ w_ih.T + b_ih
        gh = h @ w_hh.T + b_hh
        r = jax.nn.sigmoid(gi[:, :H] + gh[:, :H])
        z = jax.nn.sigmoid(gi[:, H:2 * H] + gh[:, H:2 * H])
        n = jnp.tanh(gi[:, 2 * H:] + r * gh[:, 2 * H:])
        h_new = (1.0 - z) * n + z * h
        return h_new, h_new

    h0 = jnp.zeros((B, H), jnp.float32)
    h_last, out_tm = lax.scan(step, h0, x_tm)
    return jnp.transpose(out_tm, (1, 0, 2)), h_last.reshape(1, B, H)


if __name__ == "__main__":
    # Small shapes consistent with the module.
    VOCAB, EMB = 50, 32          # encoder_vocab_size, embedding_size (= GRU hidden size)
    B, S = 2, 8
    H = EMB

    key = jax.random.PRNGKey(0)
    k_emb, k_wih, k_whh, k_bih, k_bhh, k_tok = jax.random.split(key, 6)

    bound = 1.0 / jnp.sqrt(H)
    emb_table = jax.random.normal(k_emb, (VOCAB, EMB), jnp.float32)
    w_ih = jax.random.uniform(k_wih, (3 * H, EMB), jnp.float32, -bound, bound)
    w_hh = jax.random.uniform(k_whh, (3 * H, H), jnp.float32, -bound, bound)
    b_ih = jax.random.uniform(k_bih, (3 * H,), jnp.float32, -bound, bound)
    b_hh = jax.random.uniform(k_bhh, (3 * H,), jnp.float32, -bound, bound)
    tokens = jax.random.randint(k_tok, (B, S), 0, VOCAB, jnp.int32)

    params = init_encoder_params(emb_table, w_ih, w_hh, b_ih, b_hh)   # one-time layout prep

    output, hidden = jax.block_until_ready(encoder_rnn_forward(tokens, params))

    ref_out, ref_hid = encoder_rnn_reference(tokens, emb_table, w_ih, w_hh, b_ih, b_hh)
    assert output.shape == (B, S, H) and hidden.shape == (1, B, H)
    # All-f32 kernel math -> tight tolerance vs the pure-f32 reference.
    assert jnp.allclose(output, ref_out, atol=1e-4, rtol=1e-4)
    assert jnp.allclose(hidden, ref_hid, atol=1e-4, rtol=1e-4)

    print("KERNEL_OK")
</pallas_src>

<mosaic_0001>
module attributes {stable_mosaic.version = 11 : i64} {
  func.func @_encoder_gru_kernel(%arg0: memref<2x8xi32, #tpu.memory_space<smem>>, %arg1: memref<50x32xf32, #tpu.memory_space<vmem>>, %arg2: memref<32x96xf32, #tpu.memory_space<vmem>>, %arg3: memref<32x96xf32, #tpu.memory_space<vmem>>, %arg4: memref<1x96xf32, #tpu.memory_space<vmem>>, %arg5: memref<1x32xf32, #tpu.memory_space<vmem>>, %arg6: memref<2x256xf32, #tpu.memory_space<vmem>>, %arg7: memref<2x32xf32, #tpu.memory_space<vmem>>) attributes {dimension_semantics = [], scalar_prefetch = 0 : i64, scratch_operands = 0 : i64, tpu.core_type = #tpu.core_type<tc>} {
    %c0 = arith.constant 0 : index
    %c0_0 = arith.constant 0 : index
    %0 = memref.load %arg0[%c0, %c0_0] : memref<2x8xi32, #tpu.memory_space<smem>>
    %1 = arith.index_cast %0 : i32 to index
    %c0_1 = arith.constant 0 : index
    %2 = vector.load %arg1[%1, %c0_1] : memref<50x32xf32, #tpu.memory_space<vmem>>, vector<1x32xf32>
    %c1 = arith.constant 1 : index
    %c0_2 = arith.constant 0 : index
    %3 = memref.load %arg0[%c1, %c0_2] : memref<2x8xi32, #tpu.memory_space<smem>>
    %4 = arith.index_cast %3 : i32 to index
    %c0_3 = arith.constant 0 : index
    %5 = vector.load %arg1[%4, %c0_3] : memref<50x32xf32, #tpu.memory_space<vmem>>, vector<1x32xf32>
    %c0_4 = arith.constant 0 : index
    %c1_5 = arith.constant 1 : index
    %6 = memref.load %arg0[%c0_4, %c1_5] : memref<2x8xi32, #tpu.memory_space<smem>>
    %7 = arith.index_cast %6 : i32 to index
    %c0_6 = arith.constant 0 : index
    %8 = vector.load %arg1[%7, %c0_6] : memref<50x32xf32, #tpu.memory_space<vmem>>, vector<1x32xf32>
    %c1_7 = arith.constant 1 : index
    %c1_8 = arith.constant 1 : index
    %9 = memref.load %arg0[%c1_7, %c1_8] : memref<2x8xi32, #tpu.memory_space<smem>>
    %10 = arith.index_cast %9 : i32 to index
    %c0_9 = arith.constant 0 : index
    %11 = vector.load %arg1[%10, %c0_9] : memref<50x32xf32, #tpu.memory_space<vmem>>, vector<1x32xf32>
    %c0_10 = arith.constant 0 : index
    %c2 = arith.constant 2 : index
    %12 = memref.load %arg0[%c0_10, %c2] : memref<2x8xi32, #tpu.memory_space<smem>>
    %13 = arith.index_cast %12 : i32 to index
    %c0_11 = arith.constant 0 : index
    %14 = vector.load %arg1[%13, %c0_11] : memref<50x32xf32, #tpu.memory_space<vmem>>, vector<1x32xf32>
    %c1_12 = arith.constant 1 : index
    %c2_13 = arith.constant 2 : index
    %15 = memref.load %arg0[%c1_12, %c2_13] : memref<2x8xi32, #tpu.memory_space<smem>>
    %16 = arith.index_cast %15 : i32 to index
    %c0_14 = arith.constant 0 : index
    %17 = vector.load %arg1[%16, %c0_14] : memref<50x32xf32, #tpu.memory_space<vmem>>, vector<1x32xf32>
    %c0_15 = arith.constant 0 : index
    %c3 = arith.constant 3 : index
    %18 = memref.load %arg0[%c0_15, %c3] : memref<2x8xi32, #tpu.memory_space<smem>>
    %19 = arith.index_cast %18 : i32 to index
    %c0_16 = arith.constant 0 : index
    %20 = vector.load %arg1[%19, %c0_16] : memref<50x32xf32, #tpu.memory_space<vmem>>, vector<1x32xf32>
    %c1_17 = arith.constant 1 : index
    %c3_18 = arith.constant 3 : index
    %21 = memref.load %arg0[%c1_17, %c3_18] : memref<2x8xi32, #tpu.memory_space<smem>>
    %22 = arith.index_cast %21 : i32 to index
    %c0_19 = arith.constant 0 : index
    %23 = vector.load %arg1[%22, %c0_19] : memref<50x32xf32, #tpu.memory_space<vmem>>, vector<1x32xf32>
    %c0_20 = arith.constant 0 : index
    %c4 = arith.constant 4 : index
    %24 = memref.load %arg0[%c0_20, %c4] : memref<2x8xi32, #tpu.memory_space<smem>>
    %25 = arith.index_cast %24 : i32 to index
    %c0_21 = arith.constant 0 : index
    %26 = vector.load %arg1[%25, %c0_21] : memref<50x32xf32, #tpu.memory_space<vmem>>, vector<1x32xf32>
    %c1_22 = arith.constant 1 : index
    %c4_23 = arith.constant 4 : index
    %27 = memref.load %arg0[%c1_22, %c4_23] : memref<2x8xi32, #tpu.memory_space<smem>>
    %28 = arith.index_cast %27 : i32 to index
    %c0_24 = arith.constant 0 : index
    %29 = vector.load %arg1[%28, %c0_24] : memref<50x32xf32, #tpu.memory_space<vmem>>, vector<1x32xf32>
    %c0_25 = arith.constant 0 : index
    %c5 = arith.constant 5 : index
    %30 = memref.load %arg0[%c0_25, %c5] : memref<2x8xi32, #tpu.memory_space<smem>>
    %31 = arith.index_cast %30 : i32 to index
    %c0_26 = arith.constant 0 : index
    %32 = vector.load %arg1[%31, %c0_26] : memref<50x32xf32, #tpu.memory_space<vmem>>, vector<1x32xf32>
    %c1_27 = arith.constant 1 : index
    %c5_28 = arith.constant 5 : index
    %33 = memref.load %arg0[%c1_27, %c5_28] : memref<2x8xi32, #tpu.memory_space<smem>>
    %34 = arith.index_cast %33 : i32 to index
    %c0_29 = arith.constant 0 : index
    %35 = vector.load %arg1[%34, %c0_29] : memref<50x32xf32, #tpu.memory_space<vmem>>, vector<1x32xf32>
    %c0_30 = arith.constant 0 : index
    %c6 = arith.constant 6 : index
    %36 = memref.load %arg0[%c0_30, %c6] : memref<2x8xi32, #tpu.memory_space<smem>>
    %37 = arith.index_cast %36 : i32 to index
    %c0_31 = arith.constant 0 : index
    %38 = vector.load %arg1[%37, %c0_31] : memref<50x32xf32, #tpu.memory_space<vmem>>, vector<1x32xf32>
    %c1_32 = arith.constant 1 : index
    %c6_33 = arith.constant 6 : index
    %39 = memref.load %arg0[%c1_32, %c6_33] : memref<2x8xi32, #tpu.memory_space<smem>>
    %40 = arith.index_cast %39 : i32 to index
    %c0_34 = arith.constant 0 : index
    %41 = vector.load %arg1[%40, %c0_34] : memref<50x32xf32, #tpu.memory_space<vmem>>, vector<1x32xf32>
    %c0_35 = arith.constant 0 : index
    %c7 = arith.constant 7 : index
    %42 = memref.load %arg0[%c0_35, %c7] : memref<2x8xi32, #tpu.memory_space<smem>>
    %43 = arith.index_cast %42 : i32 to index
    %c0_36 = arith.constant 0 : index
    %44 = vector.load %arg1[%43, %c0_36] : memref<50x32xf32, #tpu.memory_space<vmem>>, vector<1x32xf32>
    %c1_37 = arith.constant 1 : index
    %c7_38 = arith.constant 7 : index
    %45 = memref.load %arg0[%c1_37, %c7_38] : memref<2x8xi32, #tpu.memory_space<smem>>
    %46 = arith.index_cast %45 : i32 to index
    %c0_39 = arith.constant 0 : index
    %47 = vector.load %arg1[%46, %c0_39] : memref<50x32xf32, #tpu.memory_space<vmem>>, vector<1x32xf32>
    %48 = tpu.concatenate %2, %5, %8, %11, %14, %17, %20, %23, %26, %29, %32, %35, %38, %41, %44, %47 in 0 : vector<1x32xf32>, vector<1x32xf32>, vector<1x32xf32>, vector<1x32xf32>, vector<1x32xf32>, vector<1x32xf32>, vector<1x32xf32>, vector<1x32xf32>, vector<1x32xf32>, vector<1x32xf32>, vector<1x32xf32>, vector<1x32xf32>, vector<1x32xf32>, vector<1x32xf32>, vector<1x32xf32>, vector<1x32xf32> -> vector<16x32xf32>
    %c0_40 = arith.constant 0 : index
    %c0_41 = arith.constant 0 : index
    %49 = vector.load %arg2[%c0_40, %c0_41] : memref<32x96xf32, #tpu.memory_space<vmem>>, vector<32x96xf32>
    %cst = arith.constant dense<0.000000e+00> : vector<16x96xf32>
    %50 = tpu.matmul %48, %49, %cst {dimension_numbers = #tpu.dot_dimension_numbers<[1], [0], [0], [1], [0, 0, 1, 1], [], []>} : vector<16x32xf32>, vector<32x96xf32>, vector<16x96xf32> -> vector<16x96xf32>
    %c0_42 = arith.constant 0 : index
    %c0_43 = arith.constant 0 : index
    %51 = vector.load %arg4[%c0_42, %c0_43] : memref<1x96xf32, #tpu.memory_space<vmem>>, vector<1x96xf32>
    %52 = vector.broadcast %51 : vector<1x96xf32> to vector<16x96xf32>
    %53 = arith.addf %50, %52 : vector<16x96xf32>
    %c0_44 = arith.constant 0 : index
    %c0_45 = arith.constant 0 : index
    %54 = vector.load %arg3[%c0_44, %c0_45] : memref<32x96xf32, #tpu.memory_space<vmem>>, vector<32x96xf32>
    %c0_46 = arith.constant 0 : index
    %c0_47 = arith.constant 0 : index
    %55 = vector.load %arg5[%c0_46, %c0_47] : memref<1x32xf32, #tpu.memory_space<vmem>>, vector<1x32xf32>
    %cst_48 = arith.constant 0.000000e+00 : f32
    %56 = vector.broadcast %cst_48 : f32 to vector<2x32xf32>
    %57 = vector.extract_strided_slice %53 {offsets = [0, 0], sizes = [2, 96], strides = [1, 1]} : vector<16x96xf32> to vector<2x96xf32>
    %cst_49 = arith.constant dense<0.000000e+00> : vector<2x96xf32>
    %58 = tpu.matmul %56, %54, %cst_49 {dimension_numbers = #tpu.dot_dimension_numbers<[1], [0], [0], [1], [0, 0, 1, 1], [], []>} : vector<2x32xf32>, vector<32x96xf32>, vector<2x96xf32> -> vector<2x96xf32>
    %59 = vector.extract_strided_slice %57 {offsets = [0, 0], sizes = [2, 32], strides = [1, 1]} : vector<2x96xf32> to vector<2x32xf32>
    %60 = vector.extract_strided_slice %58 {offsets = [0, 0], sizes = [2, 32], strides = [1, 1]} : vector<2x96xf32> to vector<2x32xf32>
    %61 = arith.addf %59, %60 : vector<2x32xf32>
    %cst_50 = arith.constant 5.000000e-01 : f32
    %62 = vector.broadcast %cst_50 : f32 to vector<2x32xf32>
    %63 = arith.mulf %62, %61 : vector<2x32xf32>
    %64 = math.tanh %63 : vector<2x32xf32>
    %cst_51 = arith.constant 1.000000e+00 : f32
    %65 = vector.broadcast %cst_51 : f32 to vector<2x32xf32>
    %66 = arith.addf %64, %65 : vector<2x32xf32>
    %cst_52 = arith.constant 5.000000e-01 : f32
    %67 = vector.broadcast %cst_52 : f32 to vector<2x32xf32>
    %68 = arith.mulf %67, %66 : vector<2x32xf32>
    %69 = vector.extract_strided_slice %57 {offsets = [0, 32], sizes = [2, 32], strides = [1, 1]} : vector<2x96xf32> to vector<2x32xf32>
    %70 = vector.extract_strided_slice %58 {offsets = [0, 32], sizes = [2, 32], strides = [1, 1]} : vector<2x96xf32> to vector<2x32xf32>
    %71 = arith.addf %69, %70 : vector<2x32xf32>
    %72 = arith.negf %71 : vector<2x32xf32>
    %73 = math.exp %72 : vector<2x32xf32>
    %cst_53 = arith.constant 1.000000e+00 : f32
    %74 = vector.broadcast %cst_53 : f32 to vector<2x32xf32>
    %75 = arith.addf %74, %73 : vector<2x32xf32>
    %76 = arith.divf %74, %75 : vector<2x32xf32>
    %77 = vector.extract_strided_slice %57 {offsets = [0, 64], sizes = [2, 32], strides = [1, 1]} : vector<2x96xf32> to vector<2x32xf32>
    %78 = vector.extract_strided_slice %58 {offsets = [0, 64], sizes = [2, 32], strides = [1, 1]} : vector<2x96xf32> to vector<2x32xf32>
    %79 = vector.broadcast %55 : vector<1x32xf32> to vector<2x32xf32>
    %80 = arith.addf %78, %79 : vector<2x32xf32>
    %81 = arith.mulf %68, %80 : vector<2x32xf32>
    %82 = arith.addf %77, %81 : vector<2x32xf32>
    %83 = math.tanh %82 : vector<2x32xf32>
    %cst_54 = arith.constant 1.000000e+00 : f32
    %84 = vector.broadcast %cst_54 : f32 to vector<2x32xf32>
    %85 = arith.subf %84, %76 : vector<2x32xf32>
    %86 = arith.mulf %85, %83 : vector<2x32xf32>
    %87 = arith.mulf %76, %56 : vector<2x32xf32>
    %88 = arith.addf %86, %87 : vector<2x32xf32>
    %c0_55 = arith.constant 0 : index
    %c0_56 = arith.constant 0 : index
    %89 = vector.load %arg6[%c0_55, %c0_56] : memref<2x256xf32, #tpu.memory_space<vmem>>, vector<2x32xf32>
    tpu.vector_store %arg6[%c0_55, %c0_56], %88 {strides = array<i32>} : memref<2x256xf32, #tpu.memory_space<vmem>>, vector<2x32xf32>,
    %90 = vector.extract_strided_slice %53 {offsets = [2, 0], sizes = [2, 96], strides = [1, 1]} : vector<16x96xf32> to vector<2x96xf32>
    %cst_57 = arith.constant dense<0.000000e+00> : vector<2x96xf32>
    %91 = tpu.matmul %88, %54, %cst_57 {dimension_numbers = #tpu.dot_dimension_numbers<[1], [0], [0], [1], [0, 0, 1, 1], [], []>} : vector<2x32xf32>, vector<32x96xf32>, vector<2x96xf32> -> vector<2x96xf32>
    %92 = vector.extract_strided_slice %90 {offsets = [0, 0], sizes = [2, 32], strides = [1, 1]} : vector<2x96xf32> to vector<2x32xf32>
    %93 = vector.extract_strided_slice %91 {offsets = [0, 0], sizes = [2, 32], strides = [1, 1]} : vector<2x96xf32> to vector<2x32xf32>
    %94 = arith.addf %92, %93 : vector<2x32xf32>
    %cst_58 = arith.constant 5.000000e-01 : f32
    %95 = vector.broadcast %cst_58 : f32 to vector<2x32xf32>
    %96 = arith.mulf %95, %94 : vector<2x32xf32>
    %97 = math.tanh %96 : vector<2x32xf32>
    %cst_59 = arith.constant 1.000000e+00 : f32
    %98 = vector.broadcast %cst_59 : f32 to vector<2x32xf32>
    %99 = arith.addf %97, %98 : vector<2x32xf32>
    %cst_60 = arith.constant 5.000000e-01 : f32
    %100 = vector.broadcast %cst_60 : f32 to vector<2x32xf32>
    %101 = arith.mulf %100, %99 : vector<2x32xf32>
    %102 = vector.extract_strided_slice %90 {offsets = [0, 32], sizes = [2, 32], strides = [1, 1]} : vector<2x96xf32> to vector<2x32xf32>
    %103 = vector.extract_strided_slice %91 {offsets = [0, 32], sizes = [2, 32], strides = [1, 1]} : vector<2x96xf32> to vector<2x32xf32>
    %104 = arith.addf %102, %103 : vector<2x32xf32>
    %105 = arith.negf %104 : vector<2x32xf32>
    %106 = math.exp %105 : vector<2x32xf32>
    %cst_61 = arith.constant 1.000000e+00 : f32
    %107 = vector.broadcast %cst_61 : f32 to vector<2x32xf32>
    %108 = arith.addf %107, %106 : vector<2x32xf32>
    %109 = arith.divf %107, %108 : vector<2x32xf32>
    %110 = vector.extract_strided_slice %90 {offsets = [0, 64], sizes = [2, 32], strides = [1, 1]} : vector<2x96xf32> to vector<2x32xf32>
    %111 = vector.extract_strided_slice %91 {offsets = [0, 64], sizes = [2, 32], strides = [1, 1]} : vector<2x96xf32> to vector<2x32xf32>
    %112 = vector.broadcast %55 : vector<1x32xf32> to vector<2x32xf32>
    %113 = arith.addf %111, %112 : vector<2x32xf32>
    %114 = arith.mulf %101, %113 : vector<2x32xf32>
    %115 = arith.addf %110, %114 : vector<2x32xf32>
    %116 = math.tanh %115 : vector<2x32xf32>
    %cst_62 = arith.constant 1.000000e+00 : f32
    %117 = vector.broadcast %cst_62 : f32 to vector<2x32xf32>
    %118 = arith.subf %117, %109 : vector<2x32xf32>
    %119 = arith.mulf %118, %116 : vector<2x32xf32>
    %120 = arith.mulf %109, %88 : vector<2x32xf32>
    %121 = arith.addf %119, %120 : vector<2x32xf32>
    %c0_63 = arith.constant 0 : index
    %c32 = arith.constant 32 : index
    %122 = vector.load %arg6[%c0_63, %c32] : memref<2x256xf32, #tpu.memory_space<vmem>>, vector<2x32xf32>
    tpu.vector_store %arg6[%c0_63, %c32], %121 {strides = array<i32>} : memref<2x256xf32, #tpu.memory_space<vmem>>, vector<2x32xf32>,
    %123 = vector.extract_strided_slice %53 {offsets = [4, 0], sizes = [2, 96], strides = [1, 1]} : vector<16x96xf32> to vector<2x96xf32>
    %cst_64 = arith.constant dense<0.000000e+00> : vector<2x96xf32>
    %124 = tpu.matmul %121, %54, %cst_64 {dimension_numbers = #tpu.dot_dimension_numbers<[1], [0], [0], [1], [0, 0, 1, 1], [], []>} : vector<2x32xf32>, vector<32x96xf32>, vector<2x96xf32> -> vector<2x96xf32>
    %125 = vector.extract_strided_slice %123 {offsets = [0, 0], sizes = [2, 32], strides = [1, 1]} : vector<2x96xf32> to vector<2x32xf32>
    %126 = vector.extract_strided_slice %124 {offsets = [0, 0], sizes = [2, 32], strides = [1, 1]} : vector<2x96xf32> to vector<2x32xf32>
    %127 = arith.addf %125, %126 : vector<2x32xf32>
    %cst_65 = arith.constant 5.000000e-01 : f32
    %128 = vector.broadcast %cst_65 : f32 to vector<2x32xf32>
    %129 = arith.mulf %128, %127 : vector<2x32xf32>
    %130 = math.tanh %129 : vector<2x32xf32>
    %cst_66 = arith.constant 1.000000e+00 : f32
    %131 = vector.broadcast %cst_66 : f32 to vector<2x32xf32>
    %132 = arith.addf %130, %131 : vector<2x32xf32>
    %cst_67 = arith.constant 5.000000e-01 : f32
    %133 = vector.broadcast %cst_67 : f32 to vector<2x32xf32>
    %134 = arith.mulf %133, %132 : vector<2x32xf32>
    %135 = vector.extract_strided_slice %123 {offsets = [0, 32], sizes = [2, 32], strides = [1, 1]} : vector<2x96xf32> to vector<2x32xf32>
    %136 = vector.extract_strided_slice %124 {offsets = [0, 32], sizes = [2, 32], strides = [1, 1]} : vector<2x96xf32> to vector<2x32xf32>
    %137 = arith.addf %135, %136 : vector<2x32xf32>
    %138 = arith.negf %137 : vector<2x32xf32>
    %139 = math.exp %138 : vector<2x32xf32>
    %cst_68 = arith.constant 1.000000e+00 : f32
    %140 = vector.broadcast %cst_68 : f32 to vector<2x32xf32>
    %141 = arith.addf %140, %139 : vector<2x32xf32>
    %142 = arith.divf %140, %141 : vector<2x32xf32>
    %143 = vector.extract_strided_slice %123 {offsets = [0, 64], sizes = [2, 32], strides = [1, 1]} : vector<2x96xf32> to vector<2x32xf32>
    %144 = vector.extract_strided_slice %124 {offsets = [0, 64], sizes = [2, 32], strides = [1, 1]} : vector<2x96xf32> to vector<2x32xf32>
    %145 = vector.broadcast %55 : vector<1x32xf32> to vector<2x32xf32>
    %146 = arith.addf %144, %145 : vector<2x32xf32>
    %147 = arith.mulf %134, %146 : vector<2x32xf32>
    %148 = arith.addf %143, %147 : vector<2x32xf32>
    %149 = math.tanh %148 : vector<2x32xf32>
    %cst_69 = arith.constant 1.000000e+00 : f32
    %150 = vector.broadcast %cst_69 : f32 to vector<2x32xf32>
    %151 = arith.subf %150, %142 : vector<2x32xf32>
    %152 = arith.mulf %151, %149 : vector<2x32xf32>
    %153 = arith.mulf %142, %121 : vector<2x32xf32>
    %154 = arith.addf %152, %153 : vector<2x32xf32>
    %c0_70 = arith.constant 0 : index
    %c64 = arith.constant 64 : index
    %155 = vector.load %arg6[%c0_70, %c64] : memref<2x256xf32, #tpu.memory_space<vmem>>, vector<2x32xf32>
    tpu.vector_store %arg6[%c0_70, %c64], %154 {strides = array<i32>} : memref<2x256xf32, #tpu.memory_space<vmem>>, vector<2x32xf32>,
    %156 = vector.extract_strided_slice %53 {offsets = [6, 0], sizes = [2, 96], strides = [1, 1]} : vector<16x96xf32> to vector<2x96xf32>
    %cst_71 = arith.constant dense<0.000000e+00> : vector<2x96xf32>
    %157 = tpu.matmul %154, %54, %cst_71 {dimension_numbers = #tpu.dot_dimension_numbers<[1], [0], [0], [1], [0, 0, 1, 1], [], []>} : vector<2x32xf32>, vector<32x96xf32>, vector<2x96xf32> -> vector<2x96xf32>
    %158 = vector.extract_strided_slice %156 {offsets = [0, 0], sizes = [2, 32], strides = [1, 1]} : vector<2x96xf32> to vector<2x32xf32>
    %159 = vector.extract_strided_slice %157 {offsets = [0, 0], sizes = [2, 32], strides = [1, 1]} : vector<2x96xf32> to vector<2x32xf32>
    %160 = arith.addf %158, %159 : vector<2x32xf32>
    %cst_72 = arith.constant 5.000000e-01 : f32
    %161 = vector.broadcast %cst_72 : f32 to vector<2x32xf32>
    %162 = arith.mulf %161, %160 : vector<2x32xf32>
    %163 = math.tanh %162 : vector<2x32xf32>
    %cst_73 = arith.constant 1.000000e+00 : f32
    %164 = vector.broadcast %cst_73 : f32 to vector<2x32xf32>
    %165 = arith.addf %163, %164 : vector<2x32xf32>
    %cst_74 = arith.constant 5.000000e-01 : f32
    %166 = vector.broadcast %cst_74 : f32 to vector<2x32xf32>
    %167 = arith.mulf %166, %165 : vector<2x32xf32>
    %168 = vector.extract_strided_slice %156 {offsets = [0, 32], sizes = [2, 32], strides = [1, 1]} : vector<2x96xf32> to vector<2x32xf32>
    %169 = vector.extract_strided_slice %157 {offsets = [0, 32], sizes = [2, 32], strides = [1, 1]} : vector<2x96xf32> to vector<2x32xf32>
    %170 = arith.addf %168, %169 : vector<2x32xf32>
    %171 = arith.negf %170 : vector<2x32xf32>
    %172 = math.exp %171 : vector<2x32xf32>
    %cst_75 = arith.constant 1.000000e+00 : f32
    %173 = vector.broadcast %cst_75 : f32 to vector<2x32xf32>
    %174 = arith.addf %173, %172 : vector<2x32xf32>
    %175 = arith.divf %173, %174 : vector<2x32xf32>
    %176 = vector.extract_strided_slice %156 {offsets = [0, 64], sizes = [2, 32], strides = [1, 1]} : vector<2x96xf32> to vector<2x32xf32>
    %177 = vector.extract_strided_slice %157 {offsets = [0, 64], sizes = [2, 32], strides = [1, 1]} : vector<2x96xf32> to vector<2x32xf32>
    %178 = vector.broadcast %55 : vector<1x32xf32> to vector<2x32xf32>
    %179 = arith.addf %177, %178 : vector<2x32xf32>
    %180 = arith.mulf %167, %179 : vector<2x32xf32>
    %181 = arith.addf %176, %180 : vector<2x32xf32>
    %182 = math.tanh %181 : vector<2x32xf32>
    %cst_76 = arith.constant 1.000000e+00 : f32
    %183 = vector.broadcast %cst_76 : f32 to vector<2x32xf32>
    %184 = arith.subf %183, %175 : vector<2x32xf32>
    %185 = arith.mulf %184, %182 : vector<2x32xf32>
    %186 = arith.mulf %175, %154 : vector<2x32xf32>
    %187 = arith.addf %185, %186 : vector<2x32xf32>
    %c0_77 = arith.constant 0 : index
    %c96 = arith.constant 96 : index
    %188 = vector.load %arg6[%c0_77, %c96] : memref<2x256xf32, #tpu.memory_space<vmem>>, vector<2x32xf32>
    tpu.vector_store %arg6[%c0_77, %c96], %187 {strides = array<i32>} : memref<2x256xf32, #tpu.memory_space<vmem>>, vector<2x32xf32>,
    %189 = vector.extract_strided_slice %53 {offsets = [8, 0], sizes = [2, 96], strides = [1, 1]} : vector<16x96xf32> to vector<2x96xf32>
    %cst_78 = arith.constant dense<0.000000e+00> : vector<2x96xf32>
    %190 = tpu.matmul %187, %54, %cst_78 {dimension_numbers = #tpu.dot_dimension_numbers<[1], [0], [0], [1], [0, 0, 1, 1], [], []>} : vector<2x32xf32>, vector<32x96xf32>, vector<2x96xf32> -> vector<2x96xf32>
    %191 = vector.extract_strided_slice %189 {offsets = [0, 0], sizes = [2, 32], strides = [1, 1]} : vector<2x96xf32> to vector<2x32xf32>
    %192 = vector.extract_strided_slice %190 {offsets = [0, 0], sizes = [2, 32], strides = [1, 1]} : vector<2x96xf32> to vector<2x32xf32>
    %193 = arith.addf %191, %192 : vector<2x32xf32>
    %cst_79 = arith.constant 5.000000e-01 : f32
    %194 = vector.broadcast %cst_79 : f32 to vector<2x32xf32>
    %195 = arith.mulf %194, %193 : vector<2x32xf32>
    %196 = math.tanh %195 : vector<2x32xf32>
    %cst_80 = arith.constant 1.000000e+00 : f32
    %197 = vector.broadcast %cst_80 : f32 to vector<2x32xf32>
    %198 = arith.addf %196, %197 : vector<2x32xf32>
    %cst_81 = arith.constant 5.000000e-01 : f32
    %199 = vector.broadcast %cst_81 : f32 to vector<2x32xf32>
    %200 = arith.mulf %199, %198 : vector<2x32xf32>
    %201 = vector.extract_strided_slice %189 {offsets = [0, 32], sizes = [2, 32], strides = [1, 1]} : vector<2x96xf32> to vector<2x32xf32>
    %202 = vector.extract_strided_slice %190 {offsets = [0, 32], sizes = [2, 32], strides = [1, 1]} : vector<2x96xf32> to vector<2x32xf32>
    %203 = arith.addf %201, %202 : vector<2x32xf32>
    %204 = arith.negf %203 : vector<2x32xf32>
    %205 = math.exp %204 : vector<2x32xf32>
    %cst_82 = arith.constant 1.000000e+00 : f32
    %206 = vector.broadcast %cst_82 : f32 to vector<2x32xf32>
    %207 = arith.addf %206, %205 : vector<2x32xf32>
    %208 = arith.divf %206, %207 : vector<2x32xf32>
    %209 = vector.extract_strided_slice %189 {offsets = [0, 64], sizes = [2, 32], strides = [1, 1]} : vector<2x96xf32> to vector<2x32xf32>
    %210 = vector.extract_strided_slice %190 {offsets = [0, 64], sizes = [2, 32], strides = [1, 1]} : vector<2x96xf32> to vector<2x32xf32>
    %211 = vector.broadcast %55 : vector<1x32xf32> to vector<2x32xf32>
    %212 = arith.addf %210, %211 : vector<2x32xf32>
    %213 = arith.mulf %200, %212 : vector<2x32xf32>
    %214 = arith.addf %209, %213 : vector<2x32xf32>
    %215 = math.tanh %214 : vector<2x32xf32>
    %cst_83 = arith.constant 1.000000e+00 : f32
    %216 = vector.broadcast %cst_83 : f32 to vector<2x32xf32>
    %217 = arith.subf %216, %208 : vector<2x32xf32>
    %218 = arith.mulf %217, %215 : vector<2x32xf32>
    %219 = arith.mulf %208, %187 : vector<2x32xf32>
    %220 = arith.addf %218, %219 : vector<2x32xf32>
    %c0_84 = arith.constant 0 : index
    %c128 = arith.constant 128 : index
    %221 = vector.load %arg6[%c0_84, %c128] : memref<2x256xf32, #tpu.memory_space<vmem>>, vector<2x32xf32>
    tpu.vector_store %arg6[%c0_84, %c128], %220 {strides = array<i32>} : memref<2x256xf32, #tpu.memory_space<vmem>>, vector<2x32xf32>,
    %222 = vector.extract_strided_slice %53 {offsets = [10, 0], sizes = [2, 96], strides = [1, 1]} : vector<16x96xf32> to vector<2x96xf32>
    %cst_85 = arith.constant dense<0.000000e+00> : vector<2x96xf32>
    %223 = tpu.matmul %220, %54, %cst_85 {dimension_numbers = #tpu.dot_dimension_numbers<[1], [0], [0], [1], [0, 0, 1, 1], [], []>} : vector<2x32xf32>, vector<32x96xf32>, vector<2x96xf32> -> vector<2x96xf32>
    %224 = vector.extract_strided_slice %222 {offsets = [0, 0], sizes = [2, 32], strides = [1, 1]} : vector<2x96xf32> to vector<2x32xf32>
    %225 = vector.extract_strided_slice %223 {offsets = [0, 0], sizes = [2, 32], strides = [1, 1]} : vector<2x96xf32> to vector<2x32xf32>
    %226 = arith.addf %224, %225 : vector<2x32xf32>
    %cst_86 = arith.constant 5.000000e-01 : f32
    %227 = vector.broadcast %cst_86 : f32 to vector<2x32xf32>
    %228 = arith.mulf %227, %226 : vector<2x32xf32>
    %229 = math.tanh %228 : vector<2x32xf32>
    %cst_87 = arith.constant 1.000000e+00 : f32
    %230 = vector.broadcast %cst_87 : f32 to vector<2x32xf32>
    %231 = arith.addf %229, %230 : vector<2x32xf32>
    %cst_88 = arith.constant 5.000000e-01 : f32
    %232 = vector.broadcast %cst_88 : f32 to vector<2x32xf32>
    %233 = arith.mulf %232, %231 : vector<2x32xf32>
    %234 = vector.extract_strided_slice %222 {offsets = [0, 32], sizes = [2, 32], strides = [1, 1]} : vector<2x96xf32> to vector<2x32xf32>
    %235 = vector.extract_strided_slice %223 {offsets = [0, 32], sizes = [2, 32], strides = [1, 1]} : vector<2x96xf32> to vector<2x32xf32>
    %236 = arith.addf %234, %235 : vector<2x32xf32>
    %237 = arith.negf %236 : vector<2x32xf32>
    %238 = math.exp %237 : vector<2x32xf32>
    %cst_89 = arith.constant 1.000000e+00 : f32
    %239 = vector.broadcast %cst_89 : f32 to vector<2x32xf32>
    %240 = arith.addf %239, %238 : vector<2x32xf32>
    %241 = arith.divf %239, %240 : vector<2x32xf32>
    %242 = vector.extract_strided_slice %222 {offsets = [0, 64], sizes = [2, 32], strides = [1, 1]} : vector<2x96xf32> to vector<2x32xf32>
    %243 = vector.extract_strided_slice %223 {offsets = [0, 64], sizes = [2, 32], strides = [1, 1]} : vector<2x96xf32> to vector<2x32xf32>
    %244 = vector.broadcast %55 : vector<1x32xf32> to vector<2x32xf32>
    %245 = arith.addf %243, %244 : vector<2x32xf32>
    %246 = arith.mulf %233, %245 : vector<2x32xf32>
    %247 = arith.addf %242, %246 : vector<2x32xf32>
    %248 = math.tanh %247 : vector<2x32xf32>
    %cst_90 = arith.constant 1.000000e+00 : f32
    %249 = vector.broadcast %cst_90 : f32 to vector<2x32xf32>
    %250 = arith.subf %249, %241 : vector<2x32xf32>
    %251 = arith.mulf %250, %248 : vector<2x32xf32>
    %252 = arith.mulf %241, %220 : vector<2x32xf32>
    %253 = arith.addf %251, %252 : vector<2x32xf32>
    %c0_91 = arith.constant 0 : index
    %c160 = arith.constant 160 : index
    %254 = vector.load %arg6[%c0_91, %c160] : memref<2x256xf32, #tpu.memory_space<vmem>>, vector<2x32xf32>
    tpu.vector_store %arg6[%c0_91, %c160], %253 {strides = array<i32>} : memref<2x256xf32, #tpu.memory_space<vmem>>, vector<2x32xf32>,
    %255 = vector.extract_strided_slice %53 {offsets = [12, 0], sizes = [2, 96], strides = [1, 1]} : vector<16x96xf32> to vector<2x96xf32>
    %cst_92 = arith.constant dense<0.000000e+00> : vector<2x96xf32>
    %256 = tpu.matmul %253, %54, %cst_92 {dimension_numbers = #tpu.dot_dimension_numbers<[1], [0], [0], [1], [0, 0, 1, 1], [], []>} : vector<2x32xf32>, vector<32x96xf32>, vector<2x96xf32> -> vector<2x96xf32>
    %257 = vector.extract_strided_slice %255 {offsets = [0, 0], sizes = [2, 32], strides = [1, 1]} : vector<2x96xf32> to vector<2x32xf32>
    %258 = vector.extract_strided_slice %256 {offsets = [0, 0], sizes = [2, 32], strides = [1, 1]} : vector<2x96xf32> to vector<2x32xf32>
    %259 = arith.addf %257, %258 : vector<2x32xf32>
    %cst_93 = arith.constant 5.000000e-01 : f32
    %260 = vector.broadcast %cst_93 : f32 to vector<2x32xf32>
    %261 = arith.mulf %260, %259 : vector<2x32xf32>
    %262 = math.tanh %261 : vector<2x32xf32>
    %cst_94 = arith.constant 1.000000e+00 : f32
    %263 = vector.broadcast %cst_94 : f32 to vector<2x32xf32>
    %264 = arith.addf %262, %263 : vector<2x32xf32>
    %cst_95 = arith.constant 5.000000e-01 : f32
    %265 = vector.broadcast %cst_95 : f32 to vector<2x32xf32>
    %266 = arith.mulf %265, %264 : vector<2x32xf32>
    %267 = vector.extract_strided_slice %255 {offsets = [0, 32], sizes = [2, 32], strides = [1, 1]} : vector<2x96xf32> to vector<2x32xf32>
    %268 = vector.extract_strided_slice %256 {offsets = [0, 32], sizes = [2, 32], strides = [1, 1]} : vector<2x96xf32> to vector<2x32xf32>
    %269 = arith.addf %267, %268 : vector<2x32xf32>
    %270 = arith.negf %269 : vector<2x32xf32>
    %271 = math.exp %270 : vector<2x32xf32>
    %cst_96 = arith.constant 1.000000e+00 : f32
    %272 = vector.broadcast %cst_96 : f32 to vector<2x32xf32>
    %273 = arith.addf %272, %271 : vector<2x32xf32>
    %274 = arith.divf %272, %273 : vector<2x32xf32>
    %275 = vector.extract_strided_slice %255 {offsets = [0, 64], sizes = [2, 32], strides = [1, 1]} : vector<2x96xf32> to vector<2x32xf32>
    %276 = vector.extract_strided_slice %256 {offsets = [0, 64], sizes = [2, 32], strides = [1, 1]} : vector<2x96xf32> to vector<2x32xf32>
    %277 = vector.broadcast %55 : vector<1x32xf32> to vector<2x32xf32>
    %278 = arith.addf %276, %277 : vector<2x32xf32>
    %279 = arith.mulf %266, %278 : vector<2x32xf32>
    %280 = arith.addf %275, %279 : vector<2x32xf32>
    %281 = math.tanh %280 : vector<2x32xf32>
    %cst_97 = arith.constant 1.000000e+00 : f32
    %282 = vector.broadcast %cst_97 : f32 to vector<2x32xf32>
    %283 = arith.subf %282, %274 : vector<2x32xf32>
    %284 = arith.mulf %283, %281 : vector<2x32xf32>
    %285 = arith.mulf %274, %253 : vector<2x32xf32>
    %286 = arith.addf %284, %285 : vector<2x32xf32>
    %c0_98 = arith.constant 0 : index
    %c192 = arith.constant 192 : index
    %287 = vector.load %arg6[%c0_98, %c192] : memref<2x256xf32, #tpu.memory_space<vmem>>, vector<2x32xf32>
    tpu.vector_store %arg6[%c0_98, %c192], %286 {strides = array<i32>} : memref<2x256xf32, #tpu.memory_space<vmem>>, vector<2x32xf32>,
    %288 = vector.extract_strided_slice %53 {offsets = [14, 0], sizes = [2, 96], strides = [1, 1]} : vector<16x96xf32> to vector<2x96xf32>
    %cst_99 = arith.constant dense<0.000000e+00> : vector<2x96xf32>
    %289 = tpu.matmul %286, %54, %cst_99 {dimension_numbers = #tpu.dot_dimension_numbers<[1], [0], [0], [1], [0, 0, 1, 1], [], []>} : vector<2x32xf32>, vector<32x96xf32>, vector<2x96xf32> -> vector<2x96xf32>
    %290 = vector.extract_strided_slice %288 {offsets = [0, 0], sizes = [2, 32], strides = [1, 1]} : vector<2x96xf32> to vector<2x32xf32>
    %291 = vector.extract_strided_slice %289 {offsets = [0, 0], sizes = [2, 32], strides = [1, 1]} : vector<2x96xf32> to vector<2x32xf32>
    %292 = arith.addf %290, %291 : vector<2x32xf32>
    %cst_100 = arith.constant 5.000000e-01 : f32
    %293 = vector.broadcast %cst_100 : f32 to vector<2x32xf32>
    %294 = arith.mulf %293, %292 : vector<2x32xf32>
    %295 = math.tanh %294 : vector<2x32xf32>
    %cst_101 = arith.constant 1.000000e+00 : f32
    %296 = vector.broadcast %cst_101 : f32 to vector<2x32xf32>
    %297 = arith.addf %295, %296 : vector<2x32xf32>
    %cst_102 = arith.constant 5.000000e-01 : f32
    %298 = vector.broadcast %cst_102 : f32 to vector<2x32xf32>
    %299 = arith.mulf %298, %297 : vector<2x32xf32>
    %300 = vector.extract_strided_slice %288 {offsets = [0, 32], sizes = [2, 32], strides = [1, 1]} : vector<2x96xf32> to vector<2x32xf32>
    %301 = vector.extract_strided_slice %289 {offsets = [0, 32], sizes = [2, 32], strides = [1, 1]} : vector<2x96xf32> to vector<2x32xf32>
    %302 = arith.addf %300, %301 : vector<2x32xf32>
    %303 = arith.negf %302 : vector<2x32xf32>
    %304 = math.exp %303 : vector<2x32xf32>
    %cst_103 = arith.constant 1.000000e+00 : f32
    %305 = vector.broadcast %cst_103 : f32 to vector<2x32xf32>
    %306 = arith.addf %305, %304 : vector<2x32xf32>
    %307 = arith.divf %305, %306 : vector<2x32xf32>
    %308 = vector.extract_strided_slice %288 {offsets = [0, 64], sizes = [2, 32], strides = [1, 1]} : vector<2x96xf32> to vector<2x32xf32>
    %309 = vector.extract_strided_slice %289 {offsets = [0, 64], sizes = [2, 32], strides = [1, 1]} : vector<2x96xf32> to vector<2x32xf32>
    %310 = vector.broadcast %55 : vector<1x32xf32> to vector<2x32xf32>
    %311 = arith.addf %309, %310 : vector<2x32xf32>
    %312 = arith.mulf %299, %311 : vector<2x32xf32>
    %313 = arith.addf %308, %312 : vector<2x32xf32>
    %314 = math.tanh %313 : vector<2x32xf32>
    %cst_104 = arith.constant 1.000000e+00 : f32
    %315 = vector.broadcast %cst_104 : f32 to vector<2x32xf32>
    %316 = arith.subf %315, %307 : vector<2x32xf32>
    %317 = arith.mulf %316, %314 : vector<2x32xf32>
    %318 = arith.mulf %307, %286 : vector<2x32xf32>
    %319 = arith.addf %317, %318 : vector<2x32xf32>
    %c0_105 = arith.constant 0 : index
    %c224 = arith.constant 224 : index
    %320 = vector.load %arg6[%c0_105, %c224] : memref<2x256xf32, #tpu.memory_space<vmem>>, vector<2x32xf32>
    tpu.vector_store %arg6[%c0_105, %c224], %319 {strides = array<i32>} : memref<2x256xf32, #tpu.memory_space<vmem>>, vector<2x32xf32>,
    %c0_106 = arith.constant 0 : index
    %c0_107 = arith.constant 0 : index
    %321 = vector.load %arg7[%c0_106, %c0_107] : memref<2x32xf32, #tpu.memory_space<vmem>>, vector<2x32xf32>
    tpu.vector_store %arg7[%c0_106, %c0_107], %319 {strides = array<i32>} : memref<2x32xf32, #tpu.memory_space<vmem>>, vector<2x32xf32>,
    return
  }
}

</mosaic_0001>

<bundles_post_ra>
// kernel: encoder_rnn_forward.1
= control target key start
LH: loop header
LB: loop body
LE: loop exit
PB: predicated region body
PF: predicated region fallthrough
CT: control target
= control target key end

     0   :  { %13 = vsyncpa [#allocation4], 0  ;;  %s1355_s0 = inlined_call_operand.vmem [shape: s32[2,8], index: 0, kind: input, shape index: {}]   ;;  %s1356_s1 = inlined_call_operand.vmem [shape: f32[50,32], index: 1, kind: input, shape index: {}]   ;;  %s1357_s2 = inlined_call_operand.vmem [shape: f32[32,96], index: 2, kind: input, shape index: {}]   ;;  %s1358_s3 = inlined_call_operand.vmem [shape: f32[32,96], index: 3, kind: input, shape index: {}]   ;;  %s1359_s4 = inlined_call_operand.vmem [shape: f32[1,96], index: 4, kind: input, shape index: {}]   ;;  %s1360_s5 = inlined_call_operand.vmem [shape: f32[1,32], index: 5, kind: input, shape index: {}]   ;;  %s1361_s6 = inlined_call_operand.vmem [shape: f32[2,256], index: 6, kind: output, shape index: {0}]   ;;  %s1362_s7 = inlined_call_operand.hbm [shape: f32[2,32], index: 7, kind: output, shape index: {1}]  }
   0x1   :  { %14 = vsyncpa [#allocation3], 0  ;;  %s20_s26 = sshll.u32 %s1355_s0, 4  ;;  %s1023_s27 = smov [#allocation2]   ;;  %s21_s26 = int_to_ptr.vmem [resolvable:$true] %s20_s26 }
   0x2   :  { %23 = dma.vmem_to_smem %s21_s26, 32, %s1023_s27, [#allocation4]  }
   0x3   :  { %1019 = dma.done.wait [#allocation4], 32  }
   0x4   :  { %1020 = vsyncadd [#allocation4], 4294967264 }
   0x5   :  { %38 = sfence }
   0x6   :  { %v1075_v0 = vld [vmem:[%s1358_s3 + $0x18] sm:$0xff]  ;;  %v1080_v1 = vld [vmem:[%s1358_s3 + $0x10] sm:$0xff]  ;;  %s1082_s9 = sld [smem:[#allocation2]]  ;;  %v1097_v4 = vld [vmem:[%s1358_s3 + $0x8] sm:$0xff]  ;;  %s1024_s10 = smov 64   ;;  %v1025_v9 = vmov 0.0  }
   0x7   :  { %208 = vmatpush.msra.mxu1 %v1075_v0  ;;  %v153_v2 = vld [vmem:[%s1357_s2 + $0x18] sm:$0xff]  ;;  %v152_v3 = vld [vmem:[%s1357_s2 + $0x10] sm:$0xff]  ;;  %s1091_s13 = sld [smem:[#allocation2 + $0x80]]  ;;  %285 = vmatpush.msra.mxu2 %v1075_v0  ;;  %v1106_v5 = vld [vmem:[%s1358_s3] sm:$0xff]  ;;  %vm129_vm0 = vcmask 1040384   ;;  %vm131_vm1 = vcmask 1041408  }
   0x8   :  { %177 = vmatpush.msra.mxu0 %v153_v2  ;;  %s1099_s16 = sld [smem:[#allocation2 + $0x1]]  ;;  %367 = vmatpush.msra.mxu3 %v1075_v0  ;;  %v151_v6 = vld [vmem:[%s1357_s2 + $0x8] sm:$0xff]  ;;  %v150_v7 = vld [vmem:[%s1357_s2] sm:$0xff]  ;;  %vm133_vm2 = vcmask 1042432   ;;  %vm135_vm3 = vcmask 1043456   ;;  %vm137_vm4 = vcmask 1044480  }
   0x9   :  { %209 = vmatpush.msra.mxu1 %v1080_v1  ;;  %s1111_s21 = sld [smem:[#allocation2 + $0x81]]  ;;  %286 = vmatpush.msra.mxu2 %v1080_v1  ;;  %v917_v8 = vld [vmem:[%s1360_s5] ss:$0 sm:$0xff]  ;;  %vm139_vm5 = vcmask 1045504   ;;  %vm141_vm6 = vcmask 1046528   ;;  %vm158_vm7 = vcmask 261120  }
   0xa   :  { %178 = vmatpush.msra.mxu0 %v152_v3  ;;  %s1117_s24 = sld [smem:[#allocation2 + $0x2]]  ;;  %368 = vmatpush.msra.mxu3 %v1080_v1  ;;  %v1203_v35 = vld [vmem:[%s1359_s4] ss:$0 sm:$0xff]  ;;  %s1026_s4 = smov 96   ;;  %vm269_vm12 = vcmask 254976  }
   0xb   :  { %210 = vmatpush.msra.mxu1 %v1097_v4  ;;  %s1121_s3 = sld [smem:[#allocation2 + $0x82]]  ;;  %287 = vmatpush.msra.mxu2 %v1097_v4  ;;  %s851_s27 = sshll.u32 %s1362_s7, 4  ;;  %s852_s27 = int_to_ptr.hbm [resolvable:$true] %s851_s27 }
   0xc   :  { %179 = vmatpush.msra.mxu0 %v151_v6  ;;  %s40_s2 = scalar_lea.vmem %s1356_s1, %s1082_s9  ;;  %s1131_s29 = sld [smem:[#allocation2 + $0x3]]  ;;  %369 = vmatpush.msra.mxu3 %v1097_v4 }
   0xd   :  { %211 = vmatpush.msra.mxu1 %v1106_v5  ;;  %s43_s0 = scalar_lea.vmem %s1356_s1, %s1091_s13  ;;  %s1139_s5 = sld [smem:[#allocation2 + $0x83]]  ;;  %242 = vrot.lane.b32.xlu0 %v917_v8, %s1024_s10  ;;  %v41_v10 = vld [vmem:[%s40_s2] sm:$0x1] }
   0xe   :  { %212 = vmatmul.f32.vlgmr.msra.gmra.mxu1 %v1025_v9  ;;  %180 = vmatpush.msra.mxu0 %v150_v7  ;;  %v44_v11 = vld [vmem:[%s43_s0] sm:$0x1]  ;;  %s46_s12 = scalar_lea.vmem %s1356_s1, %s1099_s16  ;;  %s887_s0 = sld [smem:[#allocation2 + $0x84]] }
   0xf   :  { %v47_v12 = vld [vmem:[%s46_s12] sm:$0x1]  ;;  %s49_s15 = scalar_lea.vmem %s1356_s1, %s1111_s21  ;;  %v88_v13 = vrot.slane %v44_v11, 7  ;;  %288 = vmatpush.msra.mxu2 %v1106_v5  ;;  %370 = vmatpush.msra.mxu3 %v1106_v5  ;;  %s886_s9 = sld [smem:[#allocation2 + $0x4]] }
  0x10   :  { %v50_v14 = vld [vmem:[%s49_s15] sm:$0x1]  ;;  %s52_s19 = scalar_lea.vmem %s1356_s1, %s1117_s24  ;;  %v91_v15 = vrot.slane %v47_v12, 6  ;;  %451 = vmatpush.msrb.mxu1 %v1075_v0  ;;  %688 = vmatpush.msrb.mxu0 %v1075_v0  ;;  %s889_s11 = sld [smem:[#allocation2 + $0x85]] }
  0x11   :  { %535 = vmatpush.msrb.mxu2 %v1075_v0  ;;  %v53_v16 = vld [vmem:[%s52_s19] sm:$0x1]  ;;  %s55_s21 = scalar_lea.vmem %s1356_s1, %s1121_s3  ;;  %v94_v17 = vrot.slane %v50_v14, 5  ;;  %v130_v18 = vsel %vm129_vm0, %v41_v10, %v88_v13  ;;  %607 = vmatpush.msrb.mxu3 %v1075_v0  ;;  %s890_s12 = sld [smem:[#allocation2 + $0x6]] }
  0x12   :  { %v56_v19 = vld [vmem:[%s55_s21] sm:$0x1]  ;;  %s58_s24 = scalar_lea.vmem %s1356_s1, %s1131_s29  ;;  %v97_v20 = vrot.slane %v53_v16, 4  ;;  %v132_v21 = vsel %vm131_vm1, %v130_v18, %v91_v15  ;;  %452 = vmatpush.msrb.mxu1 %v1080_v1  ;;  %689 = vmatpush.msrb.mxu0 %v1080_v1  ;;  %s891_s14 = sld [smem:[#allocation2 + $0x86]] }
  0x13   :  { %536 = vmatpush.msrb.mxu2 %v1080_v1  ;;  %v59_v22 = vld [vmem:[%s58_s24] sm:$0x1]  ;;  %s61_s26 = scalar_lea.vmem %s1356_s1, %s1139_s5  ;;  %v100_v23 = vrot.slane %v56_v19, 3  ;;  %v134_v24 = vsel %vm133_vm2, %v132_v21, %v94_v17  ;;  %608 = vmatpush.msrb.mxu3 %v1080_v1  ;;  %s888_s5 = sld [smem:[#allocation2 + $0x5]] }
  0x14   :  { %v62_v25 = vld [vmem:[%s61_s26] sm:$0x1]  ;;  %v103_v26 = vrot.slane %v59_v22, 2  ;;  %v136_v27 = vsel %vm135_vm3, %v134_v24, %v97_v20  ;;  %453 = vmatpush.msrb.mxu1 %v1097_v4  ;;  %690 = vmatpush.msrb.mxu0 %v1097_v4  ;;  %s892_s13 = sld [smem:[#allocation2 + $0x7]]  ;;  %s67_s19 = scalar_lea.vmem %s1356_s1, %s887_s0 }
  0x15   :  { %537 = vmatpush.msrb.mxu2 %v1097_v4  ;;  %v106_v28 = vrot.slane %v62_v25, 1  ;;  %v138_v29 = vsel %vm137_vm4, %v136_v27, %v100_v23  ;;  %609 = vmatpush.msrb.mxu3 %v1097_v4  ;;  %s893_s15 = sld [smem:[#allocation2 + $0x87]]  ;;  %s64_s24 = scalar_lea.vmem %s1356_s1, %s886_s9 }
  0x16   :  { %v140_v30 = vsel %vm139_vm5, %v138_v29, %v103_v26  ;;  %454 = vmatpush.msrb.mxu1 %v1106_v5  ;;  %691 = vmatpush.msrb.mxu0 %v1106_v5  ;;  %s73_s26 = scalar_lea.vmem %s1356_s1, %s889_s11 }
  0x17   :  { %538 = vmatpush.msrb.mxu2 %v1106_v5  ;;  %v142_v31 = vsel %vm141_vm6, %v140_v30, %v106_v28  ;;  %610 = vmatpush.msrb.mxu3 %v1106_v5  ;;  %s76_s2 = scalar_lea.vmem %s1356_s1, %s890_s12 }
  0x18   :  { %894 = vmatmul.msk.f32.vlgmr.msra.gmra.mxu0 %vm158_vm7, %v142_v31  ;;  %771 = vmatpush.msra.mxu1 %v1075_v0  ;;  %s79_s8 = scalar_lea.vmem %s1356_s1, %s891_s14 }
  0x19   :  { %s70_s21 = scalar_lea.vmem %s1356_s1, %s888_s5 }
  0x1a   :  { %772 = vmatpush.msra.mxu1 %v1080_v1  ;;  %s82_s17 = scalar_lea.vmem %s1356_s1, %s892_s13  ;;  %s1027_s13 = smov 32  }
  0x1b   :  { %s85_s16 = scalar_lea.vmem %s1356_s1, %s893_s15 }
  0x1c   :  { %773 = vmatpush.msra.mxu1 %v1097_v4 }
  0x1e   :  { %774 = vmatpush.msra.mxu1 %v1106_v5 }
  0x7f   :  { %v1196_v32 = vpop.permute.xlu0 %242 }
  0x8b   :  { %v213_v33 = vpop.f32.mrf.mxu1 }
  0x8c   :  { %v245_v34 = vadd.f32 %v1196_v32, %v213_v33 }
  0x8e   :  { %247 = vrot.lane.b32.xlu0 %v245_v34, %s1024_s10 }
  0x95   :  { %v182_v36 = vpop.f32.mrf.mxu0 }
  0x96   :  { %v1206_v37 = vadd.f32 %v1203_v35, %v182_v36 }
  0x98   :  { %v216_v38 = vadd.f32 %v213_v33, %v1206_v37 }
  0x9a   :  { %v217_v39 = vmul.f32 0.5, %v216_v38  ;;  %v896_v48 = vmul.f32 -1.442695, %v216_v38 }
  0x9c   :  { %919 = vtanh.f32 %v217_v39 }
  0xa2   :  { %v920_v40 = vpop.eup %919 }
  0xa3   :  { %v219_v41 = vadd.f32 1.0, %v920_v40 }
  0xa5   :  { %v220_v42 = vmul.f32 0.5, %v219_v41 }
 0x100   :  { %v248_v43 = vpop.permute.xlu0 %247 }
 0x101   :  { %v250_v44 = vmul.f32 %v248_v43, %v220_v42 }
 0x103   :  { %252 = vrot.lane.b32.xlu1 %v250_v44, %s1024_s10 }
 0x175   :  { %v253_v45 = vpop.permute.xlu1 %252 }
 0x176   :  { %v255_v46 = vadd.f32 %v253_v45, %v1206_v37 }
 0x178   :  { %921 = vtanh.f32 %v255_v46 }
 0x179   :  { %923 = vpow2.f32 %v896_v48 }
 0x17e   :  { %v922_v47 = vpop.eup %921 }
 0x17f   :  { %259 = vrot.lane.b32.xlu1 %v922_v47, %s1026_s4  ;;  %v924_v49 = vpop.eup %923 }
 0x180   :  { %v224_v50 = vadd.f32 1.0, %v924_v49 }
 0x182   :  { %925 = vrcp.f32 %v224_v50  ;;  %v236_v56 = vand.u32 2147483648, %v224_v50  ;;  %vm230_vm9 = vweird.f32 %v224_v50  ;;  %v234_v57 = vand.u32 2147483647, %v224_v50 }
 0x184   :  { %v237_v59 = vor.u32 1.1754944e-38, %v236_v56  ;;  %vm235_vm11 = vcmp.eq.f32.partialorder %v234_v57, 8.507059e+37 }
 0x188   :  { %v926_v51 = vpop.eup %925 }
 0x189   :  { %v226_v52 = vmul.f32 %v926_v51, %v224_v50  ;;  %vm231_vm8 = vweird.f32 %v926_v51 }
 0x18a   :  { %vm232_vm10 = vmor %vm230_vm9, %vm231_vm8  ;;  %vm348_vm9 = vcmask 517376  }
 0x18b   :  { %v227_v53 = vsub.f32 1.0, %v226_v52 }
 0x18d   :  { %v228_v54 = vmul.f32 %v926_v51, %v227_v53 }
 0x18f   :  { %v229_v55 = vadd.f32 %v926_v51, %v228_v54 }
 0x191   :  { %v233_v58 = vsel %vm232_vm10, %v926_v51, %v229_v55 }
 0x192   :  { %v238_v60 = vsel %vm235_vm11, %v237_v59, %v233_v58 }
 0x193   :  { %v257_v61 = vsub.f32 1.0, %v238_v60  ;;  %v263_v0 = vmul.f32 0.0, %v238_v60 }
 0x1f1   :  { %v260_v62 = vpop.permute.xlu1 %259 }
 0x1f2   :  { %v262_v63 = vmul.f32 %v260_v62, %v257_v61 }
 0x1f4   :  { %v264_v1 = vadd.f32 %v263_v0, %v262_v63 }
 0x1f6   :  { %266 = vrot.lane.b32.xlu2 %v264_v1, %s1026_s4  ;;  %v339_v19 = vrot.slane %v264_v1, 6 }
 0x250   :  { %v267_v2 = vpop.permute.xlu2 %266 }
 0x251   :  { %270 = vst.msk [vmem:[%s1361_s6] sm:$0x3] %vm269_vm12, %v267_v2  ;;  %897 = vmatmul.msk.f32.vlgmr.msra.gmra.mxu2 %vm158_vm7, %v267_v2 }
 0x2d4   :  { %v290_v3 = vpop.f32.mrf.mxu2 }
 0x2d5   :  { %v294_v4 = vrot.slane %v290_v3, 6  ;;  %v320_v5 = vadd.f32 %v290_v3, %v1196_v32 }
 0x2d7   :  { %v296_v6 = vadd.f32 %v294_v4, %v1206_v37  ;;  %v322_v7 = vrot.slane %v320_v5, 6 }
 0x2d9   :  { %v898_v8 = vmul.f32 -1.442695, %v296_v6  ;;  %323 = vrot.lane.b32.xlu2 %v322_v7, %s1024_s10  ;;  %v297_v23 = vmul.f32 0.5, %v296_v6 }
 0x2db   :  { %927 = vpow2.f32 %v898_v8 }
 0x2e1   :  { %v928_v9 = vpop.eup %927 }
 0x2e2   :  { %v304_v10 = vadd.f32 1.0, %v928_v9 }
 0x2e4   :  { %929 = vrcp.f32 %v304_v10  ;;  %v316_v14 = vand.u32 2147483648, %v304_v10  ;;  %v314_v16 = vand.u32 2147483647, %v304_v10  ;;  %vm310_vm14 = vweird.f32 %v304_v10 }
 0x2e5   :  { %931 = vtanh.f32 %v297_v23 }
 0x2e6   :  { %v317_v18 = vor.u32 1.1754944e-38, %v316_v14  ;;  %vm315_vm8 = vcmp.eq.f32.partialorder %v314_v16, 8.507059e+37 }
 0x2ea   :  { %v930_v11 = vpop.eup %929 }
 0x2eb   :  { %v306_v12 = vmul.f32 %v930_v11, %v304_v10  ;;  %vm311_vm13 = vweird.f32 %v930_v11  ;;  %v932_v24 = vpop.eup %931 }
 0x2ec   :  { %vm312_vm15 = vmor %vm310_vm14, %vm311_vm13  ;;  %v299_v25 = vadd.f32 1.0, %v932_v24 }
 0x2ed   :  { %v307_v13 = vsub.f32 1.0, %v306_v12 }
 0x2ee   :  { %v300_v26 = vmul.f32 0.5, %v299_v25 }
 0x2ef   :  { %v308_v15 = vmul.f32 %v930_v11, %v307_v13 }
 0x2f1   :  { %v309_v17 = vadd.f32 %v930_v11, %v308_v15 }
 0x2f3   :  { %v313_v20 = vsel %vm312_vm15, %v930_v11, %v309_v17 }
 0x2f4   :  { %v318_v21 = vsel %vm315_vm8, %v317_v18, %v313_v20 }
 0x2f5   :  { %v341_v22 = vmul.f32 %v339_v19, %v318_v21  ;;  %v333_v33 = vsub.f32 1.0, %v318_v21 }
 0x333   :  { %v324_v27 = vpop.permute.xlu2 %323 }
 0x334   :  { %v326_v28 = vmul.f32 %v324_v27, %v300_v26 }
 0x336   :  { %328 = vrot.lane.b32.xlu0 %v326_v28, %s1024_s10 }
 0x3a8   :  { %v329_v29 = vpop.permute.xlu0 %328 }
 0x3a9   :  { %v331_v30 = vadd.f32 %v329_v29, %v1206_v37 }
 0x3ab   :  { %933 = vtanh.f32 %v331_v30 }
 0x3b1   :  { %v934_v31 = vpop.eup %933 }
 0x3b2   :  { %335 = vrot.lane.b32.xlu1 %v934_v31, %s1026_s4 }
 0x424   :  { %v336_v34 = vpop.permute.xlu1 %335 }
 0x425   :  { %v338_v36 = vmul.f32 %v336_v34, %v333_v33 }
 0x427   :  { %v342_v38 = vadd.f32 %v341_v22, %v338_v36 }
 0x429   :  { %344 = vst.sshfl [vmem:[#allocation1] sm:$0xff pattern:$0x73625140] %v342_v38  ;;  %v350_v39 = vrot.slane %v342_v38, 2  ;;  %v421_v59 = vrot.slane %v342_v38, 6 }
 0x42b   :  { %351 = vrot.lane.b32.xlu2 %v350_v39, %s1026_s4 }
 0x430   :  { %v346_v40 = vld [vmem:[#allocation1 + $0x1] ss:$4 sm:$0xff] }
 0x431   :  { %349 = vst.msk [vmem:[%s1361_s6] sm:$0x3] %vm348_vm9, %v346_v40 }
 0x485   :  { %v352_v41 = vpop.permute.xlu2 %351 }
 0x486   :  { %899 = vmatmul.msk.f32.vlgmr.msra.gmra.mxu3 %vm158_vm7, %v352_v41 }
 0x509   :  { %v372_v42 = vpop.f32.mrf.mxu3 }
 0x50a   :  { %v376_v43 = vrot.slane %v372_v42, 4  ;;  %v402_v44 = vadd.f32 %v372_v42, %v1196_v32 }
 0x50c   :  { %v378_v45 = vadd.f32 %v376_v43, %v1206_v37  ;;  %v404_v46 = vrot.slane %v402_v44, 4 }
 0x50e   :  { %v900_v47 = vmul.f32 -1.442695, %v378_v45  ;;  %405 = vrot.lane.b32.xlu0 %v404_v46, %s1024_s10  ;;  %v379_v62 = vmul.f32 0.5, %v378_v45 }
 0x510   :  { %935 = vpow2.f32 %v900_v47 }
 0x516   :  { %v936_v48 = vpop.eup %935 }
 0x517   :  { %v386_v49 = vadd.f32 1.0, %v936_v48 }
 0x519   :  { %937 = vrcp.f32 %v386_v49  ;;  %v398_v53 = vand.u32 2147483648, %v386_v49  ;;  %v396_v55 = vand.u32 2147483647, %v386_v49  ;;  %vm392_vm11 = vweird.f32 %v386_v49 }
 0x51a   :  { %939 = vtanh.f32 %v379_v62 }
 0x51b   :  { %v399_v57 = vor.u32 1.1754944e-38, %v398_v53  ;;  %vm397_vm14 = vcmp.eq.f32.partialorder %v396_v55, 8.507059e+37  ;;  %v65_v53 = vld [vmem:[%s64_s24] sm:$0x1]  ;;  %s1028_s24 = smov [#allocation5]  }
 0x51c   :  { %s849_s3 = sshll.u32 %s1028_s24, 4  ;;  %s850_s3 = int_to_ptr.vmem [resolvable:$true] %s849_s3 }
 0x51f   :  { %v938_v50 = vpop.eup %937 }
 0x520   :  { %v388_v51 = vmul.f32 %v938_v50, %v386_v49  ;;  %vm393_vm10 = vweird.f32 %v938_v50  ;;  %v940_v63 = vpop.eup %939 }
 0x521   :  { %vm394_vm13 = vmor %vm392_vm11, %vm393_vm10  ;;  %v381_v0 = vadd.f32 1.0, %v940_v63 }
 0x522   :  { %v389_v52 = vsub.f32 1.0, %v388_v51  ;;  %v71_v51 = vld [vmem:[%s70_s21] sm:$0x1] }
 0x523   :  { %v382_v1 = vmul.f32 0.5, %v381_v0  ;;  %v112_v55 = vrot.slane %v71_v51, 6 }
 0x524   :  { %v390_v54 = vmul.f32 %v938_v50, %v389_v52 }
 0x526   :  { %v391_v56 = vadd.f32 %v938_v50, %v390_v54  ;;  %v74_v54 = vld [vmem:[%s73_s26] sm:$0x1] }
 0x528   :  { %v395_v58 = vsel %vm394_vm13, %v938_v50, %v391_v56  ;;  %v77_v56 = vld [vmem:[%s76_s2] sm:$0x1] }
 0x529   :  { %v400_v60 = vsel %vm397_vm14, %v399_v57, %v395_v58  ;;  %v115_v57 = vrot.slane %v74_v54, 5  ;;  %v118_v63 = vrot.slane %v77_v56, 4 }
 0x52a   :  { %v423_v61 = vmul.f32 %v421_v59, %v400_v60  ;;  %v415_v7 = vsub.f32 1.0, %v400_v60  ;;  %v80_v59 = vld [vmem:[%s79_s8] sm:$0x1] }
 0x52b   :  { %v83_v60 = vld [vmem:[%s82_s17] sm:$0x1]  ;;  %v121_v0 = vrot.slane %v80_v59, 3 }
 0x580   :  { %v406_v2 = vpop.permute.xlu0 %405 }
 0x581   :  { %v408_v3 = vmul.f32 %v406_v2, %v382_v1  ;;  %v124_v1 = vrot.slane %v83_v60, 2 }
 0x583   :  { %410 = vrot.lane.b32.xlu1 %v408_v3, %s1024_s10 }
 0x5f5   :  { %v411_v4 = vpop.permute.xlu1 %410 }
 0x5f6   :  { %v413_v5 = vadd.f32 %v411_v4, %v1206_v37 }
 0x5f8   :  { %941 = vtanh.f32 %v413_v5 }
 0x5fe   :  { %v942_v6 = vpop.eup %941 }
 0x5ff   :  { %417 = vrot.lane.b32.xlu2 %v942_v6, %s1026_s4 }
 0x659   :  { %v418_v8 = vpop.permute.xlu2 %417 }
 0x65a   :  { %v420_v9 = vmul.f32 %v418_v8, %v415_v7 }
 0x65c   :  { %v424_v10 = vadd.f32 %v423_v61, %v420_v9  ;;  %v86_v61 = vld [vmem:[%s85_s16] sm:$0x1] }
 0x65d   :  { %v127_v2 = vrot.slane %v86_v61, 1 }
 0x65e   :  { %426 = vst.sshfl [vmem:[#allocation1] sm:$0xff pattern:$0x73625140] %v424_v10  ;;  %v434_v11 = vrot.slane %v424_v10, 4  ;;  %v505_v30 = vrot.slane %v424_v10, 6 }
 0x660   :  { %435 = vrot.lane.b32.xlu0 %v434_v11, %s1026_s4 }
 0x665   :  { %v1246_v49 = vld [vmem:[#allocation1 + $0x2] ss:$4 sm:$0xff] }
 0x6d2   :  { %v436_v12 = vpop.permute.xlu0 %435 }
 0x6d3   :  { %901 = vmatmul.msk.f32.vlgmr.msrb.gmra.mxu1 %vm158_vm7, %v436_v12 }
 0x750   :  { %v456_v13 = vpop.f32.mrf.mxu1 }
 0x751   :  { %v460_v14 = vrot.slane %v456_v13, 2  ;;  %v486_v15 = vadd.f32 %v456_v13, %v1196_v32 }
 0x753   :  { %v462_v16 = vadd.f32 %v460_v14, %v1206_v37  ;;  %v488_v17 = vrot.slane %v486_v15, 2 }
 0x755   :  { %v902_v18 = vmul.f32 -1.442695, %v462_v16  ;;  %489 = vrot.lane.b32.xlu1 %v488_v17, %s1024_s10  ;;  %v463_v34 = vmul.f32 0.5, %v462_v16 }
 0x757   :  { %943 = vpow2.f32 %v902_v18 }
 0x75d   :  { %v944_v19 = vpop.eup %943 }
 0x75e   :  { %v470_v20 = vadd.f32 1.0, %v944_v19 }
 0x760   :  { %945 = vrcp.f32 %v470_v20  ;;  %v482_v24 = vand.u32 2147483648, %v470_v20  ;;  %v480_v26 = vand.u32 2147483647, %v470_v20  ;;  %vm476_vm8 = vweird.f32 %v470_v20 }
 0x761   :  { %947 = vtanh.f32 %v463_v34 }
 0x762   :  { %v483_v28 = vor.u32 1.1754944e-38, %v482_v24  ;;  %vm481_vm11 = vcmp.eq.f32.partialorder %v480_v26, 8.507059e+37 }
 0x766   :  { %v946_v21 = vpop.eup %945 }
 0x767   :  { %v472_v22 = vmul.f32 %v946_v21, %v470_v20  ;;  %vm477_vm15 = vweird.f32 %v946_v21  ;;  %v948_v36 = vpop.eup %947 }
 0x768   :  { %vm478_vm10 = vmor %vm476_vm8, %vm477_vm15  ;;  %v465_v38 = vadd.f32 1.0, %v948_v36 }
 0x769   :  { %v473_v23 = vsub.f32 1.0, %v472_v22 }
 0x76a   :  { %v466_v39 = vmul.f32 0.5, %v465_v38 }
 0x76b   :  { %v474_v25 = vmul.f32 %v946_v21, %v473_v23 }
 0x76d   :  { %v475_v27 = vadd.f32 %v946_v21, %v474_v25 }
 0x76f   :  { %v479_v29 = vsel %vm478_vm10, %v946_v21, %v475_v27 }
 0x770   :  { %v484_v31 = vsel %vm481_vm11, %v483_v28, %v479_v29 }
 0x771   :  { %v507_v33 = vmul.f32 %v505_v30, %v484_v31  ;;  %v499_v45 = vsub.f32 1.0, %v484_v31 }
 0x7c7   :  { %v490_v40 = vpop.permute.xlu1 %489 }
 0x7c8   :  { %v492_v41 = vmul.f32 %v490_v40, %v466_v39 }
 0x7ca   :  { %494 = vrot.lane.b32.xlu2 %v492_v41, %s1024_s10 }
 0x824   :  { %v495_v42 = vpop.permute.xlu2 %494 }
 0x825   :  { %v497_v43 = vadd.f32 %v495_v42, %v1206_v37  ;;  %v68_v37 = vld [vmem:[%s67_s19] sm:$0x1] }
 0x826   :  { %v109_v52 = vrot.slane %v68_v37, 7 }
 0x827   :  { %949 = vtanh.f32 %v497_v43 }
 0x828   :  { %v143_v58 = vsel %vm129_vm0, %v65_v53, %v109_v52 }
 0x829   :  { %v144_v62 = vsel %vm131_vm1, %v143_v58, %v112_v55 }
 0x82a   :  { %v145_v3 = vsel %vm133_vm2, %v144_v62, %v115_v57 }
 0x82b   :  { %v146_v4 = vsel %vm135_vm3, %v145_v3, %v118_v63 }
 0x82c   :  { %v147_v5 = vsel %vm137_vm4, %v146_v4, %v121_v0 }
 0x82d   :  { %v950_v44 = vpop.eup %949  ;;  %v148_v6 = vsel %vm139_vm5, %v147_v5, %v124_v1 }
 0x82e   :  { %501 = vrot.lane.b32.xlu0 %v950_v44, %s1026_s4  ;;  %v149_v7 = vsel %vm141_vm6, %v148_v6, %v127_v2 }
 0x82f   :  { %895 = vmatmul.msk.f32.gmra.mxu0 %vm158_vm7, %v149_v7 }
 0x8a0   :  { %v502_v46 = vpop.permute.xlu0 %501 }
 0x8a1   :  { %v504_v47 = vmul.f32 %v502_v46, %v499_v45 }
 0x8a3   :  { %v1244_v48 = vadd.f32 %v507_v33, %v504_v47 }
 0x8a5   :  { %v518_v50 = vrot.slane %v1244_v48, 6  ;;  %510 = vst.sshfl [vmem:[#allocation1] sm:$0xff pattern:$0x73625140] %v1244_v48 }
 0x8a7   :  { %519 = vrot.lane.b32.xlu1 %v518_v50, %s1026_s4 }
 0x8ac   :  { %v185_v11 = vpop.f32.mrf.mxu0 }
 0x8ad   :  { %v1289_v12 = vadd.f32 %v1203_v35, %v185_v11 }
 0x919   :  { %v520_v8 = vpop.permute.xlu1 %519 }
 0x91a   :  { %903 = vmatmul.msk.f32.vlgmr.msrb.gmra.mxu2 %vm158_vm7, %v520_v8 }
 0x99d   :  { %v540_v9 = vpop.f32.mrf.mxu2 }
 0x99e   :  { %v567_v10 = vadd.f32 %v540_v9, %v1196_v32  ;;  %v543_v13 = vadd.f32 %v540_v9, %v1289_v12 }
 0x9a0   :  { %569 = vrot.lane.b32.xlu2 %v567_v10, %s1024_s10  ;;  %v544_v14 = vmul.f32 0.5, %v543_v13  ;;  %v904_v35 = vmul.f32 -1.442695, %v543_v13 }
 0x9a2   :  { %951 = vtanh.f32 %v544_v14  ;;  %v1309_v14 = vld [vmem:[#allocation1 + $0x3] ss:$4 sm:$0xff] }
 0x9a8   :  { %v952_v15 = vpop.eup %951 }
 0x9a9   :  { %v546_v16 = vadd.f32 1.0, %v952_v15 }
 0x9ab   :  { %v547_v17 = vmul.f32 0.5, %v546_v16 }
 0x9fa   :  { %v570_v18 = vpop.permute.xlu2 %569 }
 0x9fb   :  { %v572_v19 = vmul.f32 %v570_v18, %v547_v17 }
 0x9fd   :  { %574 = vrot.lane.b32.xlu0 %v572_v19, %s1024_s10 }
 0xa6f   :  { %v575_v20 = vpop.permute.xlu0 %574 }
 0xa70   :  { %v577_v21 = vadd.f32 %v575_v20, %v1289_v12 }
 0xa72   :  { %953 = vtanh.f32 %v577_v21 }
 0xa73   :  { %955 = vpow2.f32 %v904_v35 }
 0xa78   :  { %v954_v22 = vpop.eup %953 }
 0xa79   :  { %581 = vrot.lane.b32.xlu1 %v954_v22, %s1026_s4  ;;  %v956_v23 = vpop.eup %955 }
 0xa7a   :  { %v551_v24 = vadd.f32 1.0, %v956_v23 }
 0xa7c   :  { %957 = vrcp.f32 %v551_v24  ;;  %v563_v30 = vand.u32 2147483648, %v551_v24  ;;  %vm557_vm1 = vweird.f32 %v551_v24  ;;  %v561_v31 = vand.u32 2147483647, %v551_v24 }
 0xa7e   :  { %v564_v34 = vor.u32 1.1754944e-38, %v563_v30  ;;  %vm562_vm3 = vcmp.eq.f32.partialorder %v561_v31, 8.507059e+37 }
 0xa82   :  { %v958_v25 = vpop.eup %957 }
 0xa83   :  { %v553_v26 = vmul.f32 %v958_v25, %v551_v24  ;;  %vm558_vm0 = vweird.f32 %v958_v25 }
 0xa84   :  { %vm559_vm2 = vmor %vm557_vm1, %vm558_vm0  ;;  %vm432_vm0 = vcmask 779776   ;;  %vm516_vm1 = vcmask 1042176  }
 0xa85   :  { %v554_v27 = vsub.f32 1.0, %v553_v26 }
 0xa87   :  { %v555_v28 = vmul.f32 %v958_v25, %v554_v27 }
 0xa89   :  { %v556_v29 = vadd.f32 %v958_v25, %v555_v28 }
 0xa8b   :  { %v560_v33 = vsel %vm559_vm2, %v958_v25, %v556_v29  ;;  %vm840_vm2 = vcmask 261126  }
 0xa8c   :  { %v565_v36 = vsel %vm562_vm3, %v564_v34, %v560_v33 }
 0xa8d   :  { %v579_v38 = vsub.f32 1.0, %v565_v36  ;;  %v586_v40 = vmul.f32 %v565_v36, %v518_v50 }
 0xaeb   :  { %v582_v39 = vpop.permute.xlu1 %581 }
 0xaec   :  { %v584_v41 = vmul.f32 %v582_v39, %v579_v38 }
 0xaee   :  { %v587_v42 = vadd.f32 %v586_v40, %v584_v41 }
 0xaf0   :  { %589 = vrot.lane.b32.xlu2 %v587_v42, %s1026_s4  ;;  %v661_v60 = vrot.slane %v587_v42, 6 }
 0xb4a   :  { %v590_v43 = vpop.permute.xlu2 %589 }
 0xb4b   :  { %592 = vst.msk [vmem:[%s1361_s6 + $0x2] sm:$0x3] %vm269_vm12, %v590_v43  ;;  %905 = vmatmul.msk.f32.vlgmr.msrb.gmra.mxu3 %vm158_vm7, %v590_v43 }
 0xbce   :  { %v612_v44 = vpop.f32.mrf.mxu3 }
 0xbcf   :  { %v616_v45 = vrot.slane %v612_v44, 6  ;;  %v642_v46 = vadd.f32 %v612_v44, %v1196_v32 }
 0xbd1   :  { %v618_v47 = vadd.f32 %v616_v45, %v1289_v12  ;;  %v644_v48 = vrot.slane %v642_v46, 6 }
 0xbd3   :  { %v906_v50 = vmul.f32 -1.442695, %v618_v47  ;;  %645 = vrot.lane.b32.xlu0 %v644_v48, %s1024_s10  ;;  %v619_v0 = vmul.f32 0.5, %v618_v47 }
 0xbd5   :  { %959 = vpow2.f32 %v906_v50 }
 0xbdb   :  { %v960_v37 = vpop.eup %959 }
 0xbdc   :  { %v626_v51 = vadd.f32 1.0, %v960_v37 }
 0xbde   :  { %961 = vrcp.f32 %v626_v51  ;;  %v638_v55 = vand.u32 2147483648, %v626_v51  ;;  %v636_v57 = vand.u32 2147483647, %v626_v51  ;;  %vm632_vm5 = vweird.f32 %v626_v51 }
 0xbdf   :  { %963 = vtanh.f32 %v619_v0 }
 0xbe0   :  { %v639_v59 = vor.u32 1.1754944e-38, %v638_v55  ;;  %vm637_vm12 = vcmp.eq.f32.partialorder %v636_v57, 8.507059e+37 }
 0xbe4   :  { %v962_v52 = vpop.eup %961 }
 0xbe5   :  { %v628_v53 = vmul.f32 %v962_v52, %v626_v51  ;;  %vm633_vm4 = vweird.f32 %v962_v52  ;;  %v964_v1 = vpop.eup %963 }
 0xbe6   :  { %vm634_vm6 = vmor %vm632_vm5, %vm633_vm4  ;;  %v621_v2 = vadd.f32 1.0, %v964_v1 }
 0xbe7   :  { %v629_v54 = vsub.f32 1.0, %v628_v53 }
 0xbe8   :  { %v622_v3 = vmul.f32 0.5, %v621_v2 }
 0xbe9   :  { %v630_v56 = vmul.f32 %v962_v52, %v629_v54 }
 0xbeb   :  { %v631_v58 = vadd.f32 %v962_v52, %v630_v56 }
 0xbed   :  { %v635_v61 = vsel %vm634_vm6, %v962_v52, %v631_v58 }
 0xbee   :  { %v640_v62 = vsel %vm637_vm12, %v639_v59, %v635_v61 }
 0xbef   :  { %v663_v63 = vmul.f32 %v661_v60, %v640_v62  ;;  %v655_v9 = vsub.f32 1.0, %v640_v62 }
 0xc45   :  { %v646_v4 = vpop.permute.xlu0 %645 }
 0xc46   :  { %v648_v5 = vmul.f32 %v646_v4, %v622_v3 }
 0xc48   :  { %650 = vrot.lane.b32.xlu1 %v648_v5, %s1024_s10 }
 0xcba   :  { %v651_v6 = vpop.permute.xlu1 %650 }
 0xcbb   :  { %v653_v7 = vadd.f32 %v651_v6, %v1289_v12 }
 0xcbd   :  { %965 = vtanh.f32 %v653_v7 }
 0xcc3   :  { %v966_v8 = vpop.eup %965 }
 0xcc4   :  { %657 = vrot.lane.b32.xlu2 %v966_v8, %s1026_s4 }
 0xd1e   :  { %v658_v10 = vpop.permute.xlu2 %657 }
 0xd1f   :  { %v660_v11 = vmul.f32 %v658_v10, %v655_v9 }
 0xd21   :  { %v664_v13 = vadd.f32 %v663_v63, %v660_v11 }
 0xd23   :  { %v671_v15 = vrot.slane %v664_v13, 2  ;;  %666 = vst.sshfl [vmem:[#allocation1] sm:$0xff pattern:$0x73625140] %v664_v13  ;;  %v742_v36 = vrot.slane %v664_v13, 6 }
 0xd25   :  { %672 = vrot.lane.b32.xlu0 %v671_v15, %s1026_s4 }
 0xd2a   :  { %v668_v16 = vld [vmem:[#allocation1 + $0x1] ss:$4 sm:$0xff] }
 0xd2b   :  { %670 = vst.msk [vmem:[%s1361_s6 + $0x2] sm:$0x3] %vm348_vm9, %v668_v16 }
 0xd97   :  { %v673_v17 = vpop.permute.xlu0 %672 }
 0xd98   :  { %907 = vmatmul.msk.f32.vlgmr.msrb.gmra.mxu0 %vm158_vm7, %v673_v17 }
 0xe15   :  { %v693_v18 = vpop.f32.mrf.mxu0 }
 0xe16   :  { %v697_v19 = vrot.slane %v693_v18, 4  ;;  %v723_v20 = vadd.f32 %v693_v18, %v1196_v32 }
 0xe18   :  { %v699_v21 = vadd.f32 %v697_v19, %v1289_v12  ;;  %v725_v22 = vrot.slane %v723_v20, 4 }
 0xe1a   :  { %v908_v35 = vmul.f32 -1.442695, %v699_v21  ;;  %726 = vrot.lane.b32.xlu1 %v725_v22, %s1024_s10  ;;  %v700_v40 = vmul.f32 0.5, %v699_v21 }
 0xe1c   :  { %967 = vpow2.f32 %v908_v35 }
 0xe22   :  { %v968_v23 = vpop.eup %967 }
 0xe23   :  { %v707_v24 = vadd.f32 1.0, %v968_v23 }
 0xe25   :  { %969 = vrcp.f32 %v707_v24  ;;  %v719_v28 = vand.u32 2147483648, %v707_v24  ;;  %v717_v30 = vand.u32 2147483647, %v707_v24  ;;  %vm713_vm13 = vweird.f32 %v707_v24 }
 0xe26   :  { %971 = vtanh.f32 %v700_v40 }
 0xe27   :  { %v720_v33 = vor.u32 1.1754944e-38, %v719_v28  ;;  %vm718_vm15 = vcmp.eq.f32.partialorder %v717_v30, 8.507059e+37 }
 0xe2b   :  { %v970_v25 = vpop.eup %969 }
 0xe2c   :  { %v709_v26 = vmul.f32 %v970_v25, %v707_v24  ;;  %vm714_vm9 = vweird.f32 %v970_v25  ;;  %v972_v41 = vpop.eup %971 }
 0xe2d   :  { %vm715_vm14 = vmor %vm713_vm13, %vm714_vm9  ;;  %v702_v42 = vadd.f32 1.0, %v972_v41 }
 0xe2e   :  { %v710_v27 = vsub.f32 1.0, %v709_v26 }
 0xe2f   :  { %v703_v43 = vmul.f32 0.5, %v702_v42 }
 0xe30   :  { %v711_v29 = vmul.f32 %v970_v25, %v710_v27 }
 0xe32   :  { %v712_v31 = vadd.f32 %v970_v25, %v711_v29 }
 0xe34   :  { %v716_v34 = vsel %vm715_vm14, %v970_v25, %v712_v31 }
 0xe35   :  { %v721_v38 = vsel %vm718_vm15, %v720_v33, %v716_v34 }
 0xe36   :  { %v744_v39 = vmul.f32 %v742_v36, %v721_v38  ;;  %v736_v50 = vsub.f32 1.0, %v721_v38 }
 0xe8c   :  { %v727_v44 = vpop.permute.xlu1 %726 }
 0xe8d   :  { %v729_v45 = vmul.f32 %v727_v44, %v703_v43 }
 0xe8f   :  { %731 = vrot.lane.b32.xlu2 %v729_v45, %s1024_s10 }
 0xee9   :  { %v732_v46 = vpop.permute.xlu2 %731 }
 0xeea   :  { %v734_v47 = vadd.f32 %v732_v46, %v1289_v12 }
 0xeec   :  { %973 = vtanh.f32 %v734_v47 }
 0xef2   :  { %v974_v48 = vpop.eup %973 }
 0xef3   :  { %738 = vrot.lane.b32.xlu0 %v974_v48, %s1026_s4 }
 0xf65   :  { %v739_v37 = vpop.permute.xlu0 %738 }
 0xf66   :  { %v741_v51 = vmul.f32 %v739_v37, %v736_v50 }
 0xf68   :  { %v745_v52 = vadd.f32 %v744_v39, %v741_v51 }
 0xf6a   :  { %v754_v53 = vrot.slane %v745_v52, 4  ;;  %747 = vst.sshfl [vmem:[#allocation1] sm:$0xff pattern:$0x73625140] %v745_v52  ;;  %v825_v7 = vrot.slane %v745_v52, 6 }
 0xf6c   :  { %755 = vrot.lane.b32.xlu1 %v754_v53, %s1026_s4 }
 0xf71   :  { %v749_v17 = vld [vmem:[#allocation1 + $0x2] ss:$4 sm:$0xff] }
 0xfde   :  { %v756_v54 = vpop.permute.xlu1 %755 }
 0xfdf   :  { %909 = vmatmul.msk.f32.vlgmr.msra.gmra.mxu1 %vm158_vm7, %v756_v54 }
0x105c   :  { %v776_v55 = vpop.f32.mrf.mxu1 }
0x105d   :  { %v780_v56 = vrot.slane %v776_v55, 2  ;;  %v806_v57 = vadd.f32 %v776_v55, %v1196_v32 }
0x105f   :  { %v782_v58 = vadd.f32 %v780_v56, %v1289_v12  ;;  %v808_v59 = vrot.slane %v806_v57, 2 }
0x1061   :  { %v910_v60 = vmul.f32 -1.442695, %v782_v58  ;;  %809 = vrot.lane.b32.xlu2 %v808_v59, %s1024_s10  ;;  %v783_v9 = vmul.f32 0.5, %v782_v58 }
0x1063   :  { %975 = vpow2.f32 %v910_v60 }
0x1069   :  { %v976_v61 = vpop.eup %975  ;;  %429 = vrot.lane.b32.xlu2 %v1246_v49, %s1027_s13 }
0x106a   :  { %v790_v62 = vadd.f32 1.0, %v976_v61 }
0x106c   :  { %977 = vrcp.f32 %v790_v62  ;;  %v802_v1 = vand.u32 2147483648, %v790_v62  ;;  %v800_v3 = vand.u32 2147483647, %v790_v62  ;;  %vm796_vm8 = vweird.f32 %v790_v62 }
0x106d   :  { %979 = vtanh.f32 %v783_v9 }
0x106e   :  { %v803_v5 = vor.u32 1.1754944e-38, %v802_v1  ;;  %vm801_vm11 = vcmp.eq.f32.partialorder %v800_v3, 8.507059e+37 }
0x1071   :  { %513 = vrot.lane.b32.xlu2 %v1309_v14, %s1024_s10 }
0x1072   :  { %v978_v63 = vpop.eup %977 }
0x1073   :  { %v792_v0 = vmul.f32 %v978_v63, %v790_v62  ;;  %vm797_vm7 = vweird.f32 %v978_v63  ;;  %v980_v10 = vpop.eup %979 }
0x1074   :  { %vm798_vm10 = vmor %vm796_vm8, %vm797_vm7  ;;  %v785_v11 = vadd.f32 1.0, %v980_v10 }
0x1075   :  { %v793_v32 = vsub.f32 1.0, %v792_v0 }
0x1076   :  { %v786_v13 = vmul.f32 0.5, %v785_v11 }
0x1077   :  { %v794_v2 = vmul.f32 %v978_v63, %v793_v32 }
0x1079   :  { %v795_v4 = vadd.f32 %v978_v63, %v794_v2 }
0x107b   :  { %v799_v6 = vsel %vm798_vm10, %v978_v63, %v795_v4 }
0x107c   :  { %v804_v49 = vsel %vm801_vm11, %v803_v5, %v799_v6 }
0x107d   :  { %v827_v8 = vmul.f32 %v825_v7, %v804_v49  ;;  %v819_v35 = vsub.f32 1.0, %v804_v49 }
0x10bb   :  { %v810_v14 = vpop.permute.xlu2 %809 }
0x10bc   :  { %v812_v15 = vmul.f32 %v810_v14, %v786_v13 }
0x10be   :  { %814 = vrot.lane.b32.xlu0 %v812_v15, %s1024_s10 }
0x10c3   :  { %v430_v16 = vpop.permute.xlu2 %429 }
0x10c4   :  { %433 = vst.msk [vmem:[%s1361_s6] sm:$0x3] %vm432_vm0, %v430_v16 }
0x10c6   :  { %750 = vrot.lane.b32.xlu0 %v749_v17, %s1027_s13 }
0x10cb   :  { %v514_v18 = vpop.permute.xlu2 %513 }
0x10cc   :  { %517 = vst.msk [vmem:[%s1361_s6] sm:$0x3] %vm516_vm1, %v514_v18 }
0x1130   :  { %v815_v19 = vpop.permute.xlu0 %814 }
0x1131   :  { %v817_v20 = vadd.f32 %v815_v19, %v1289_v12 }
0x1133   :  { %981 = vtanh.f32 %v817_v20 }
0x1138   :  { %v751_v21 = vpop.permute.xlu0 %750 }
0x1139   :  { %v982_v22 = vpop.eup %981  ;;  %753 = vst.msk [vmem:[%s1361_s6 + $0x2] sm:$0x3] %vm432_vm0, %v751_v21 }
0x113a   :  { %821 = vrot.lane.b32.xlu1 %v982_v22, %s1026_s4 }
0x11ac   :  { %v822_v23 = vpop.permute.xlu1 %821 }
0x11ad   :  { %v824_v24 = vmul.f32 %v822_v23, %v819_v35 }
0x11af   :  { %v828_v25 = vadd.f32 %v827_v8, %v824_v24 }
0x11b1   :  { %830 = vst.sshfl [vmem:[#allocation1] sm:$0xff pattern:$0x73625140] %v828_v25  ;;  %837 = vrot.lane.b32.xlu1 %v828_v25, %s1026_s4 }
0x11b8   :  { %v832_v26 = vld [vmem:[#allocation1 + $0x3] ss:$4 sm:$0xff] }
0x11b9   :  { %833 = vrot.lane.b32.xlu0 %v832_v26, %s1024_s10 }
0x1223   :  { %v838_v12 = vpop.permute.xlu1 %837 }
0x1224   :  { %841 = vst.msk [vmem:[#allocation5 - $0x6] sm:$0xc0] %vm840_vm2, %v838_v12 }
0x1225   :  { %854 = dma.vmem_to_hbm [thread:$0]  %s850_s3, 32, %s852_s27, [#allocation3]  }
0x122b   :  { %v834_v27 = vpop.permute.xlu0 %833 }
0x122c   :  { %836 = vst.msk [vmem:[%s1361_s6 + $0x2] sm:$0x3] %vm516_vm1, %v834_v27 }
0x122d   :  { %1021 = dma.done.wait [#allocation3], 32  }
0x122e   :  { %1022 = vsyncadd [#allocation3], 4294967264 }
0x122f   :  { %861 = vsyncpa [#allocation3], 1 }
0x1230   :  { %862 = vsyncpa [#allocation4], 1 }

</bundles_post_ra>
